<compile_context>
chip_gen: v7x
topology: tpu7x:2x2x1
jax: 0.10.0
libtpu: 0.0.40
codegen_flags: <defaults>
</compile_context>

<pallas_src>
import functools

import jax
import jax.numpy as jnp
import numpy as np
from jax.experimental import pallas as pl
from jax.experimental.pallas import tpu as pltpu


def _round_up(x, m):
    return ((x + m - 1) // m) * m


def _vmem_estimate(rows, C, Cp, K, hrows, out_bytes):
    """Rough per-step VMEM working set (bytes) for block sizing / vmem limit."""
    x_blk = 2 * rows * C * 4                       # double-buffered input block
    o_blk = 2 * rows * C * out_bytes               # double-buffered output block
    wts = 2 * (C * 2 * Cp * 2 + K * Cp * 4 + Cp * C * 2 + 8 * Cp * 4 + C * 4)
    scratch = hrows * Cp * 2                       # bf16 haloed GLU scratch
    inter = rows * 2 * Cp * 4 + rows * Cp * 4 + rows * Cp * 2  # y12, y, y_bf16
    return x_blk + o_blk + wts + scratch + inter


def _pick_block_b(B, T, C, Cp, K, slot, halo, out_bytes,
                  target_rows=1024, vmem_budget=40 << 20):
    """Batches per grid step.

    Big enough to amortize the ~0.35us/step overhead and feed the MXU a few
    hundred rows, but (a) keep >=4 grid steps when B allows it (2 per
    TensorCore on v7x so BlockSpec double-buffering can overlap DMA with
    compute on each core) and (b) stay under a VMEM budget that is safe on
    v7x's 64 MiB part.
    """
    bb = max(1, min(B, max(1, target_rows // max(T, 1))))
    if B >= 4:
        bb = min(bb, -(-B // 4))          # ceil(B/4): >= 4 grid steps
    while bb > 1 and _vmem_estimate(bb * T, C, Cp, K,
                                    halo + bb * slot, out_bytes) > vmem_budget:
        bb -= 1
    return max(bb, 1)


def _conv_module_kernel(
    x_ref,      # (bB*T, C)   f32  input block (bB whole batches)
    w1_ref,     # (C, 2*Cp)   bf16 fused [value | gate] pointwise_conv1
    wd_ref,     # (K, Cp)     f32  depthwise taps, pre-scaled by BN scale
    w2_ref,     # (Cp, C)     bf16 pointwise_conv2
    vec_ref,    # (8, Cp)     f32  row0=b1a, row1=b1g, row2=bd*bn_scale+bn_shift
    b2_ref,     # (1, C)      f32  pointwise_conv2 bias
    o_ref,      # (bB*T, C)   out_dtype
    yb_ref,     # (Hrows, Cp) bf16 scratch: per-batch GLU slots with zero halos
    *,
    kernel_size: int,
    seq_len: int,
    block_b: int,
    slot: int,
    halo: int,
    total_rows: int,
    ragged: bool,
):
    rows, _ = x_ref.shape
    Cp = yb_ref.shape[1]
    K = kernel_size
    T = seq_len
    pad = (K - 1) // 2

    w_d = wd_ref[...]          # (K, Cp) f32
    vecs = vec_ref[...]        # (8, Cp) f32
    w2 = w2_ref[...]           # (Cp, C) bf16
    b2 = b2_ref[...]           # (1, C)  f32

    # ---- pointwise_conv1 (value|gate fused) + GLU; bf16 operands, f32 acc ----
    y12 = jnp.dot(x_ref[...].astype(jnp.bfloat16), w1_ref[...],
                  preferred_element_type=jnp.float32)      # (rows, 2*Cp)
    a = y12[:, :Cp] + vecs[0:1, :]
    g = y12[:, Cp:] + vecs[1:2, :]
    y = a * jax.nn.sigmoid(g)                              # (rows, Cp) f32

    if ragged:
        # Last grid step may cover batches beyond B: zero them so garbage never
        # reaches the scratch (their output rows are dropped by Pallas anyway).
        r = jax.lax.broadcasted_iota(jnp.int32, (rows, 1), 0)
        nvalid = total_rows - pl.program_id(0) * rows
        y = jnp.where(r < nvalid, y, 0.0)

    # Cast once; the K-tap loop then reads/relayouts bf16 data (half the vregs).
    y_bf = y.astype(jnp.bfloat16)

    # ---- stage GLU output into the zero-haloed scratch (per-batch slots) ----
    # Layout: [halo zeros][batch0 (T rows)][gap>=pad zeros][batch1]...  The gaps
    # are rewritten every step (megacore-safe: no cross-step scratch state), so
    # every tap read below sees true zero padding with zero per-tap masks.
    if halo > 0:
        yb_ref[0:halo, :] = jnp.zeros((halo, Cp), jnp.bfloat16)
    for b in range(block_b):
        base = halo + b * slot
        if slot > T:
            yb_ref[base + T: base + slot, :] = jnp.zeros((slot - T, Cp),
                                                         jnp.bfloat16)
        yb_ref[base: base + T, :] = y_bf[b * T:(b + 1) * T, :]

    # ---- depthwise conv (BN folded) + ReLU + pointwise_conv2, per batch -----
    shift0 = jnp.broadcast_to(vecs[2:3, :], (T, Cp))   # bd*bn_scale + bn_shift
    wd_rows = [w_d[j:j + 1, :] for j in range(K)]      # hoisted out of b-loop
    for b in range(block_b):
        base = halo + b * slot
        acc = shift0
        for j in range(K):
            s = base + j - pad                         # static offset, in-bounds
            acc = acc + yb_ref[s: s + T, :] * wd_rows[j]
        z = jnp.maximum(acc, 0.0).astype(jnp.bfloat16)
        out = jnp.dot(z, w2, preferred_element_type=jnp.float32) + b2
        o_ref[b * T:(b + 1) * T, :] = out.astype(o_ref.dtype)


def pack_params(params, channels, kernel_size):
    """Fold BN/biases and pad/cast weights ONCE (hoisted out of the forward)."""
    C, K = channels, kernel_size
    assert (K - 1) % 2 == 0, "kernel_size must be odd (PyTorch padding=(K-1)//2)"
    Cp = _round_up(C, 128)                      # lane-dense internal channel dim

    w1 = jnp.zeros((C, 2 * Cp), jnp.float32)
    w1 = w1.at[:, :C].set(params["w1a"])
    w1 = w1.at[:, Cp:Cp + C].set(params["w1g"])
    w1 = w1.astype(jnp.bfloat16)

    w2 = jnp.zeros((Cp, C), jnp.float32).at[:C, :].set(params["w2"])
    w2 = w2.astype(jnp.bfloat16)

    bn_scale = params["bn_scale"][0]            # (C,)
    wd = jnp.zeros((K, Cp), jnp.float32).at[:, :C].set(
        params["wd"] * bn_scale[None, :])
    shift = params["bd"][0] * bn_scale + params["bn_shift"][0]

    vecs = jnp.zeros((8, Cp), jnp.float32)
    vecs = vecs.at[0, :C].set(params["b1a"][0])
    vecs = vecs.at[1, :C].set(params["b1g"][0])
    vecs = vecs.at[2, :C].set(shift)
    b2 = params["b2"].reshape(1, C).astype(jnp.float32)

    return {"w1": w1, "wd": wd, "w2": w2, "vecs": vecs, "b2": b2,
            "channels": C, "kernel_size": K, "cp": Cp}


def convolution_module(x, packed, out_dtype=jnp.bfloat16, target_rows=1024):
    """x: (B, T, C) float32 -> (B, T, C) in out_dtype (bf16 default)."""
    B, T, C = x.shape
    K = packed["kernel_size"]
    Cp = packed["cp"]
    assert C == packed["channels"]
    assert (K - 1) % 2 == 0, "depthwise kernel_size must be odd"
    assert T % 8 == 0, "time length must be a multiple of 8 (sublane alignment)"
    pad = (K - 1) // 2

    halo = _round_up(pad, 8)            # aligned left halo of batch 0
    slot = _round_up(T + pad, 8)        # aligned per-batch slot in the scratch
    # Zero-gap invariant that makes the tap loop mask-free (see review note).
    assert slot >= T + pad and halo >= pad

    out_bytes = jnp.dtype(out_dtype).itemsize
    bB = _pick_block_b(B, T, C, Cp, K, slot, halo, out_bytes, target_rows)
    rows_blk = bB * T
    hrows = halo + bB * slot
    n_blocks = pl.cdiv(B, bB)
    ragged = (B % bB) != 0

    x2 = x.reshape(B * T, C)            # free view: no pad/copy pass in HBM

    grid_spec = pltpu.PrefetchScalarGridSpec(
        num_scalar_prefetch=0,
        grid=(n_blocks,),
        in_specs=[
            pl.BlockSpec((rows_blk, C), lambda i: (i, 0)),     # x
            pl.BlockSpec((C, 2 * Cp), lambda i: (0, 0)),       # w1 (fused)
            pl.BlockSpec((K, Cp), lambda i: (0, 0)),           # depthwise taps
            pl.BlockSpec((Cp, C), lambda i: (0, 0)),           # w2
            pl.BlockSpec((8, Cp), lambda i: (0, 0)),           # packed vectors
            pl.BlockSpec((1, C), lambda i: (0, 0)),            # b2
        ],
        out_specs=pl.BlockSpec((rows_blk, C), lambda i: (i, 0)),
        scratch_shapes=[pltpu.VMEM((hrows, Cp), jnp.bfloat16)],
    )

    kernel = functools.partial(
        _conv_module_kernel,
        kernel_size=K, seq_len=T, block_b=bB, slot=slot, halo=halo,
        total_rows=B * T, ragged=ragged)

    est = _vmem_estimate(rows_blk, C, Cp, K, hrows, out_bytes)
    vmem_limit = int(min(max(2 * est, 32 << 20), 56 << 20))   # safe on 64MiB v7x

    out2 = pl.pallas_call(
        kernel,
        out_shape=jax.ShapeDtypeStruct((B * T, C), out_dtype),
        grid_spec=grid_spec,
        compiler_params=pltpu.CompilerParams(
            dimension_semantics=("parallel",),
            vmem_limit_bytes=vmem_limit),
    )(x2, packed["w1"], packed["wd"], packed["w2"], packed["vecs"], packed["b2"])

    return out2.reshape(B, T, C)        # free view: no crop pass


def ref_forward(x, params, kernel_size):
    """Pure-JAX reference (f32, channels-last), inference-mode BatchNorm."""
    B, T, C = x.shape
    pad = (kernel_size - 1) // 2
    hp = jax.lax.Precision.HIGHEST
    a = jnp.dot(x, params["w1a"], precision=hp) + params["b1a"]
    g = jnp.dot(x, params["w1g"], precision=hp) + params["b1g"]
    y = a * jax.nn.sigmoid(g)
    y_pad = jnp.pad(y, ((0, 0), (pad, pad), (0, 0)))
    acc = jnp.broadcast_to(params["bd"], y.shape)
    for j in range(kernel_size):
        acc = acc + y_pad[:, j:j + T, :] * params["wd"][j][None, None, :]
    z = jnp.maximum(acc * params["bn_scale"] + params["bn_shift"], 0.0)
    return jnp.dot(z, params["w2"], precision=hp) + params["b2"]


def make_params(key, channels, kernel_size):
    C, K = channels, kernel_size
    ks = jax.random.split(key, 8)
    scale = 0.1
    q = lambda w: w.astype(jnp.bfloat16).astype(jnp.float32)  # shared bf16 grid
    # pointwise_conv1: Conv1d(C, 2C, 1) -> value/gate halves, stored transposed
    # so the kernel computes x @ W (GLU(dim=channels): first half * sigm(second)).
    w1a = q(scale * jax.random.normal(ks[0], (C, C), jnp.float32))
    w1g = q(scale * jax.random.normal(ks[1], (C, C), jnp.float32))
    b1 = scale * jax.random.normal(ks[2], (2 * C,), jnp.float32)
    b1a, b1g = b1[:C].reshape(1, C), b1[C:].reshape(1, C)
    # depthwise_conv: Conv1d(C, C, K, groups=C): weight (C, 1, K) -> (K, C)
    wd = scale * jax.random.normal(ks[3], (K, C), jnp.float32)
    bd = scale * jax.random.normal(ks[4], (1, C), jnp.float32)
    # BatchNorm1d (inference): fold gamma/beta/running stats into scale/shift.
    gamma = 1.0 + 0.1 * jax.random.normal(ks[5], (C,), jnp.float32)
    beta = 0.1 * jax.random.normal(ks[6], (C,), jnp.float32)
    running_mean = jnp.zeros((C,), jnp.float32)
    running_var = jnp.ones((C,), jnp.float32)
    eps = 1e-5
    bn_scale = (gamma / jnp.sqrt(running_var + eps)).reshape(1, C)
    bn_shift = (beta - running_mean * bn_scale[0]).reshape(1, C)
    # pointwise_conv2: Conv1d(C, C, 1), transposed.
    w2 = q(scale * jax.random.normal(ks[7], (C, C), jnp.float32))
    b2 = scale * jax.random.normal(jax.random.fold_in(key, 99), (1, C), jnp.float32)
    return {
        "w1a": w1a, "b1a": b1a, "w1g": w1g, "b1g": b1g,
        "wd": wd, "bd": bd, "bn_scale": bn_scale, "bn_shift": bn_shift,
        "w2": w2, "b2": b2,
    }


if __name__ == "__main__":
    B, T, C, K = 4, 64, 64, 15   # (batch, time, channels), conformer kernel_size

    key = jax.random.PRNGKey(0)
    kx, kp = jax.random.split(key)
    x = jax.random.normal(kx, (B, T, C), jnp.float32)
    # Round x to bf16-representable values so the kernel (bf16 matmul operands)
    # and the f32 reference see identical inputs.
    x = x.astype(jnp.bfloat16).astype(jnp.float32)

    raw = make_params(kp, C, K)
    packed = pack_params(raw, C, K)     # hoisted: once per weight set, not per call

    out = jax.block_until_ready(convolution_module(x, packed))
    ref = jax.block_until_ready(ref_forward(x, raw, K))

    np.testing.assert_allclose(np.asarray(out.astype(jnp.float32)),
                               np.asarray(ref), rtol=2e-2, atol=2e-2)
    print("KERNEL_OK")
</pallas_src>

<mosaic_0001>
module attributes {stable_mosaic.version = 11 : i64} {
  func.func @_conv_module_kernel(%arg0: i32, %arg1: memref<64x64xf32, #tpu.memory_space<vmem>>, %arg2: memref<64x256xbf16, #tpu.memory_space<vmem>>, %arg3: memref<15x128xf32, #tpu.memory_space<vmem>>, %arg4: memref<128x64xbf16, #tpu.memory_space<vmem>>, %arg5: memref<8x128xf32, #tpu.memory_space<vmem>>, %arg6: memref<1x64xf32, #tpu.memory_space<vmem>>, %arg7: memref<64x64xbf16, #tpu.memory_space<vmem>>, %arg8: memref<80x128xbf16, #tpu.memory_space<vmem>>) attributes {dimension_semantics = [#tpu.dimension_semantics<parallel>], iteration_bounds = array<i64: 4>, scalar_prefetch = 0 : i64, scratch_operands = 1 : i64, tpu.core_type = #tpu.core_type<tc>, window_params = [{transform_indices = @transform_0, window_bounds = array<i64: 64, 64>}, {pipeline_mode = #tpu.pipeline_mode<synchronous>, transform_indices = @transform_1, window_bounds = array<i64: 64, 256>}, {pipeline_mode = #tpu.pipeline_mode<synchronous>, transform_indices = @transform_2, window_bounds = array<i64: 15, 128>}, {pipeline_mode = #tpu.pipeline_mode<synchronous>, transform_indices = @transform_3, window_bounds = array<i64: 128, 64>}, {pipeline_mode = #tpu.pipeline_mode<synchronous>, transform_indices = @transform_4, window_bounds = array<i64: 8, 128>}, {pipeline_mode = #tpu.pipeline_mode<synchronous>, transform_indices = @transform_5, window_bounds = array<i64: 1, 64>}, {transform_indices = @transform_6, window_bounds = array<i64: 64, 64>}]} {
    %c0 = arith.constant 0 : index
    %c0_0 = arith.constant 0 : index
    %0 = vector.load %arg3[%c0, %c0_0] : memref<15x128xf32, #tpu.memory_space<vmem>>, vector<15x128xf32>
    %c0_1 = arith.constant 0 : index
    %c0_2 = arith.constant 0 : index
    %1 = vector.load %arg5[%c0_1, %c0_2] : memref<8x128xf32, #tpu.memory_space<vmem>>, vector<8x128xf32>
    %c0_3 = arith.constant 0 : index
    %c0_4 = arith.constant 0 : index
    %2 = vector.load %arg4[%c0_3, %c0_4] : memref<128x64xbf16, #tpu.memory_space<vmem>>, vector<128x64xbf16>
    %c0_5 = arith.constant 0 : index
    %c0_6 = arith.constant 0 : index
    %3 = vector.load %arg6[%c0_5, %c0_6] : memref<1x64xf32, #tpu.memory_space<vmem>>, vector<1x64xf32>
    %c0_7 = arith.constant 0 : index
    %c0_8 = arith.constant 0 : index
    %4 = vector.load %arg1[%c0_7, %c0_8] : memref<64x64xf32, #tpu.memory_space<vmem>>, vector<64x64xf32>
    %5 = arith.truncf %4 : vector<64x64xf32> to vector<64x64xbf16>
    %c0_9 = arith.constant 0 : index
    %c0_10 = arith.constant 0 : index
    %6 = vector.load %arg2[%c0_9, %c0_10] : memref<64x256xbf16, #tpu.memory_space<vmem>>, vector<64x256xbf16>
    %cst = arith.constant dense<0.000000e+00> : vector<64x256xf32>
    %7 = tpu.matmul %5, %6, %cst {dimension_numbers = #tpu.dot_dimension_numbers<[1], [0], [0], [1], [0, 0, 1, 1], [], []>} : vector<64x64xbf16>, vector<64x256xbf16>, vector<64x256xf32> -> vector<64x256xf32>
    %8 = vector.extract_strided_slice %7 {offsets = [0, 0], sizes = [64, 128], strides = [1, 1]} : vector<64x256xf32> to vector<64x128xf32>
    %9 = vector.extract_strided_slice %1 {offsets = [0, 0], sizes = [1, 128], strides = [1, 1]} : vector<8x128xf32> to vector<1x128xf32>
    %10 = vector.broadcast %9 : vector<1x128xf32> to vector<64x128xf32>
    %11 = arith.addf %8, %10 : vector<64x128xf32>
    %12 = vector.extract_strided_slice %7 {offsets = [0, 128], sizes = [64, 128], strides = [1, 1]} : vector<64x256xf32> to vector<64x128xf32>
    %13 = vector.extract_strided_slice %1 {offsets = [1, 0], sizes = [1, 128], strides = [1, 1]} : vector<8x128xf32> to vector<1x128xf32>
    %14 = vector.broadcast %13 : vector<1x128xf32> to vector<64x128xf32>
    %15 = arith.addf %12, %14 : vector<64x128xf32>
    %16 = arith.negf %15 : vector<64x128xf32>
    %17 = math.exp %16 : vector<64x128xf32>
    %cst_11 = arith.constant 1.000000e+00 : f32
    %18 = vector.broadcast %cst_11 : f32 to vector<64x128xf32>
    %19 = arith.addf %18, %17 : vector<64x128xf32>
    %20 = arith.divf %18, %19 : vector<64x128xf32>
    %21 = arith.mulf %11, %20 : vector<64x128xf32>
    %22 = arith.truncf %21 : vector<64x128xf32> to vector<64x128xbf16>
    %cst_12 = arith.constant 0.000000e+00 : bf16
    %23 = vector.broadcast %cst_12 : bf16 to vector<8x128xbf16>
    %c0_13 = arith.constant 0 : index
    %c0_14 = arith.constant 0 : index
    %24 = vector.load %arg8[%c0_13, %c0_14] : memref<80x128xbf16, #tpu.memory_space<vmem>>, vector<8x128xbf16>
    tpu.vector_store %arg8[%c0_13, %c0_14], %23 {strides = array<i32>} : memref<80x128xbf16, #tpu.memory_space<vmem>>, vector<8x128xbf16>,
    %cst_15 = arith.constant 0.000000e+00 : bf16
    %25 = vector.broadcast %cst_15 : bf16 to vector<8x128xbf16>
    %c72 = arith.constant 72 : index
    %c0_16 = arith.constant 0 : index
    %26 = vector.load %arg8[%c72, %c0_16] : memref<80x128xbf16, #tpu.memory_space<vmem>>, vector<8x128xbf16>
    tpu.vector_store %arg8[%c72, %c0_16], %25 {strides = array<i32>} : memref<80x128xbf16, #tpu.memory_space<vmem>>, vector<8x128xbf16>,
    %c8 = arith.constant 8 : index
    %c0_17 = arith.constant 0 : index
    %27 = vector.load %arg8[%c8, %c0_17] : memref<80x128xbf16, #tpu.memory_space<vmem>>, vector<64x128xbf16>
    tpu.vector_store %arg8[%c8, %c0_17], %22 {strides = array<i32>} : memref<80x128xbf16, #tpu.memory_space<vmem>>, vector<64x128xbf16>,
    %28 = vector.extract_strided_slice %1 {offsets = [2, 0], sizes = [1, 128], strides = [1, 1]} : vector<8x128xf32> to vector<1x128xf32>
    %29 = vector.shape_cast %28 : vector<1x128xf32> to vector<1x128xf32>
    %30 = vector.broadcast %29 : vector<1x128xf32> to vector<64x128xf32>
    %31 = vector.extract_strided_slice %0 {offsets = [0, 0], sizes = [1, 128], strides = [1, 1]} : vector<15x128xf32> to vector<1x128xf32>
    %32 = vector.extract_strided_slice %0 {offsets = [1, 0], sizes = [1, 128], strides = [1, 1]} : vector<15x128xf32> to vector<1x128xf32>
    %33 = vector.extract_strided_slice %0 {offsets = [2, 0], sizes = [1, 128], strides = [1, 1]} : vector<15x128xf32> to vector<1x128xf32>
    %34 = vector.extract_strided_slice %0 {offsets = [3, 0], sizes = [1, 128], strides = [1, 1]} : vector<15x128xf32> to vector<1x128xf32>
    %35 = vector.extract_strided_slice %0 {offsets = [4, 0], sizes = [1, 128], strides = [1, 1]} : vector<15x128xf32> to vector<1x128xf32>
    %36 = vector.extract_strided_slice %0 {offsets = [5, 0], sizes = [1, 128], strides = [1, 1]} : vector<15x128xf32> to vector<1x128xf32>
    %37 = vector.extract_strided_slice %0 {offsets = [6, 0], sizes = [1, 128], strides = [1, 1]} : vector<15x128xf32> to vector<1x128xf32>
    %38 = vector.extract_strided_slice %0 {offsets = [7, 0], sizes = [1, 128], strides = [1, 1]} : vector<15x128xf32> to vector<1x128xf32>
    %39 = vector.extract_strided_slice %0 {offsets = [8, 0], sizes = [1, 128], strides = [1, 1]} : vector<15x128xf32> to vector<1x128xf32>
    %40 = vector.extract_strided_slice %0 {offsets = [9, 0], sizes = [1, 128], strides = [1, 1]} : vector<15x128xf32> to vector<1x128xf32>
    %41 = vector.extract_strided_slice %0 {offsets = [10, 0], sizes = [1, 128], strides = [1, 1]} : vector<15x128xf32> to vector<1x128xf32>
    %42 = vector.extract_strided_slice %0 {offsets = [11, 0], sizes = [1, 128], strides = [1, 1]} : vector<15x128xf32> to vector<1x128xf32>
    %43 = vector.extract_strided_slice %0 {offsets = [12, 0], sizes = [1, 128], strides = [1, 1]} : vector<15x128xf32> to vector<1x128xf32>
    %44 = vector.extract_strided_slice %0 {offsets = [13, 0], sizes = [1, 128], strides = [1, 1]} : vector<15x128xf32> to vector<1x128xf32>
    %45 = vector.extract_strided_slice %0 {offsets = [14, 0], sizes = [1, 128], strides = [1, 1]} : vector<15x128xf32> to vector<1x128xf32>
    %c1 = arith.constant 1 : index
    %c0_18 = arith.constant 0 : index
    %46 = vector.load %arg8[%c1, %c0_18] : memref<80x128xbf16, #tpu.memory_space<vmem>>, vector<64x128xbf16>
    %47 = arith.extf %46 : vector<64x128xbf16> to vector<64x128xf32>
    %48 = vector.broadcast %31 : vector<1x128xf32> to vector<64x128xf32>
    %49 = arith.mulf %47, %48 : vector<64x128xf32>
    %50 = arith.addf %30, %49 : vector<64x128xf32>
    %c2 = arith.constant 2 : index
    %c0_19 = arith.constant 0 : index
    %51 = vector.load %arg8[%c2, %c0_19] : memref<80x128xbf16, #tpu.memory_space<vmem>>, vector<64x128xbf16>
    %52 = arith.extf %51 : vector<64x128xbf16> to vector<64x128xf32>
    %53 = vector.broadcast %32 : vector<1x128xf32> to vector<64x128xf32>
    %54 = arith.mulf %52, %53 : vector<64x128xf32>
    %55 = arith.addf %50, %54 : vector<64x128xf32>
    %c3 = arith.constant 3 : index
    %c0_20 = arith.constant 0 : index
    %56 = vector.load %arg8[%c3, %c0_20] : memref<80x128xbf16, #tpu.memory_space<vmem>>, vector<64x128xbf16>
    %57 = arith.extf %56 : vector<64x128xbf16> to vector<64x128xf32>
    %58 = vector.broadcast %33 : vector<1x128xf32> to vector<64x128xf32>
    %59 = arith.mulf %57, %58 : vector<64x128xf32>
    %60 = arith.addf %55, %59 : vector<64x128xf32>
    %c4 = arith.constant 4 : index
    %c0_21 = arith.constant 0 : index
    %61 = vector.load %arg8[%c4, %c0_21] : memref<80x128xbf16, #tpu.memory_space<vmem>>, vector<64x128xbf16>
    %62 = arith.extf %61 : vector<64x128xbf16> to vector<64x128xf32>
    %63 = vector.broadcast %34 : vector<1x128xf32> to vector<64x128xf32>
    %64 = arith.mulf %62, %63 : vector<64x128xf32>
    %65 = arith.addf %60, %64 : vector<64x128xf32>
    %c5 = arith.constant 5 : index
    %c0_22 = arith.constant 0 : index
    %66 = vector.load %arg8[%c5, %c0_22] : memref<80x128xbf16, #tpu.memory_space<vmem>>, vector<64x128xbf16>
    %67 = arith.extf %66 : vector<64x128xbf16> to vector<64x128xf32>
    %68 = vector.broadcast %35 : vector<1x128xf32> to vector<64x128xf32>
    %69 = arith.mulf %67, %68 : vector<64x128xf32>
    %70 = arith.addf %65, %69 : vector<64x128xf32>
    %c6 = arith.constant 6 : index
    %c0_23 = arith.constant 0 : index
    %71 = vector.load %arg8[%c6, %c0_23] : memref<80x128xbf16, #tpu.memory_space<vmem>>, vector<64x128xbf16>
    %72 = arith.extf %71 : vector<64x128xbf16> to vector<64x128xf32>
    %73 = vector.broadcast %36 : vector<1x128xf32> to vector<64x128xf32>
    %74 = arith.mulf %72, %73 : vector<64x128xf32>
    %75 = arith.addf %70, %74 : vector<64x128xf32>
    %c7 = arith.constant 7 : index
    %c0_24 = arith.constant 0 : index
    %76 = vector.load %arg8[%c7, %c0_24] : memref<80x128xbf16, #tpu.memory_space<vmem>>, vector<64x128xbf16>
    %77 = arith.extf %76 : vector<64x128xbf16> to vector<64x128xf32>
    %78 = vector.broadcast %37 : vector<1x128xf32> to vector<64x128xf32>
    %79 = arith.mulf %77, %78 : vector<64x128xf32>
    %80 = arith.addf %75, %79 : vector<64x128xf32>
    %c8_25 = arith.constant 8 : index
    %c0_26 = arith.constant 0 : index
    %81 = vector.load %arg8[%c8_25, %c0_26] : memref<80x128xbf16, #tpu.memory_space<vmem>>, vector<64x128xbf16>
    %82 = arith.extf %81 : vector<64x128xbf16> to vector<64x128xf32>
    %83 = vector.broadcast %38 : vector<1x128xf32> to vector<64x128xf32>
    %84 = arith.mulf %82, %83 : vector<64x128xf32>
    %85 = arith.addf %80, %84 : vector<64x128xf32>
    %c9 = arith.constant 9 : index
    %c0_27 = arith.constant 0 : index
    %86 = vector.load %arg8[%c9, %c0_27] : memref<80x128xbf16, #tpu.memory_space<vmem>>, vector<64x128xbf16>
    %87 = arith.extf %86 : vector<64x128xbf16> to vector<64x128xf32>
    %88 = vector.broadcast %39 : vector<1x128xf32> to vector<64x128xf32>
    %89 = arith.mulf %87, %88 : vector<64x128xf32>
    %90 = arith.addf %85, %89 : vector<64x128xf32>
    %c10 = arith.constant 10 : index
    %c0_28 = arith.constant 0 : index
    %91 = vector.load %arg8[%c10, %c0_28] : memref<80x128xbf16, #tpu.memory_space<vmem>>, vector<64x128xbf16>
    %92 = arith.extf %91 : vector<64x128xbf16> to vector<64x128xf32>
    %93 = vector.broadcast %40 : vector<1x128xf32> to vector<64x128xf32>
    %94 = arith.mulf %92, %93 : vector<64x128xf32>
    %95 = arith.addf %90, %94 : vector<64x128xf32>
    %c11 = arith.constant 11 : index
    %c0_29 = arith.constant 0 : index
    %96 = vector.load %arg8[%c11, %c0_29] : memref<80x128xbf16, #tpu.memory_space<vmem>>, vector<64x128xbf16>
    %97 = arith.extf %96 : vector<64x128xbf16> to vector<64x128xf32>
    %98 = vector.broadcast %41 : vector<1x128xf32> to vector<64x128xf32>
    %99 = arith.mulf %97, %98 : vector<64x128xf32>
    %100 = arith.addf %95, %99 : vector<64x128xf32>
    %c12 = arith.constant 12 : index
    %c0_30 = arith.constant 0 : index
    %101 = vector.load %arg8[%c12, %c0_30] : memref<80x128xbf16, #tpu.memory_space<vmem>>, vector<64x128xbf16>
    %102 = arith.extf %101 : vector<64x128xbf16> to vector<64x128xf32>
    %103 = vector.broadcast %42 : vector<1x128xf32> to vector<64x128xf32>
    %104 = arith.mulf %102, %103 : vector<64x128xf32>
    %105 = arith.addf %100, %104 : vector<64x128xf32>
    %c13 = arith.constant 13 : index
    %c0_31 = arith.constant 0 : index
    %106 = vector.load %arg8[%c13, %c0_31] : memref<80x128xbf16, #tpu.memory_space<vmem>>, vector<64x128xbf16>
    %107 = arith.extf %106 : vector<64x128xbf16> to vector<64x128xf32>
    %108 = vector.broadcast %43 : vector<1x128xf32> to vector<64x128xf32>
    %109 = arith.mulf %107, %108 : vector<64x128xf32>
    %110 = arith.addf %105, %109 : vector<64x128xf32>
    %c14 = arith.constant 14 : index
    %c0_32 = arith.constant 0 : index
    %111 = vector.load %arg8[%c14, %c0_32] : memref<80x128xbf16, #tpu.memory_space<vmem>>, vector<64x128xbf16>
    %112 = arith.extf %111 : vector<64x128xbf16> to vector<64x128xf32>
    %113 = vector.broadcast %44 : vector<1x128xf32> to vector<64x128xf32>
    %114 = arith.mulf %112, %113 : vector<64x128xf32>
    %115 = arith.addf %110, %114 : vector<64x128xf32>
    %c15 = arith.constant 15 : index
    %c0_33 = arith.constant 0 : index
    %116 = vector.load %arg8[%c15, %c0_33] : memref<80x128xbf16, #tpu.memory_space<vmem>>, vector<64x128xbf16>
    %117 = arith.extf %116 : vector<64x128xbf16> to vector<64x128xf32>
    %118 = vector.broadcast %45 : vector<1x128xf32> to vector<64x128xf32>
    %119 = arith.mulf %117, %118 : vector<64x128xf32>
    %120 = arith.addf %115, %119 : vector<64x128xf32>
    %cst_34 = arith.constant 0.000000e+00 : f32
    %121 = vector.broadcast %cst_34 : f32 to vector<64x128xf32>
    %122 = arith.maximumf %120, %121 : vector<64x128xf32>
    %123 = arith.truncf %122 : vector<64x128xf32> to vector<64x128xbf16>
    %cst_35 = arith.constant dense<0.000000e+00> : vector<64x64xf32>
    %124 = tpu.matmul %123, %2, %cst_35 {dimension_numbers = #tpu.dot_dimension_numbers<[1], [0], [0], [1], [0, 0, 1, 1], [], []>} : vector<64x128xbf16>, vector<128x64xbf16>, vector<64x64xf32> -> vector<64x64xf32>
    %125 = vector.broadcast %3 : vector<1x64xf32> to vector<64x64xf32>
    %126 = arith.addf %124, %125 : vector<64x64xf32>
    %127 = arith.truncf %126 : vector<64x64xf32> to vector<64x64xbf16>
    %c0_36 = arith.constant 0 : index
    %c0_37 = arith.constant 0 : index
    %128 = vector.load %arg7[%c0_36, %c0_37] : memref<64x64xbf16, #tpu.memory_space<vmem>>, vector<64x64xbf16>
    tpu.vector_store %arg7[%c0_36, %c0_37], %127 {strides = array<i32>} : memref<64x64xbf16, #tpu.memory_space<vmem>>, vector<64x64xbf16>,
    return
  }
  func.func @transform_0(%arg0: i32) -> (i32, i32) {
    %c0_i32 = arith.constant 0 : i32
    %c0_i32_0 = arith.constant 0 : i32
    return %arg0, %c0_i32 : i32, i32
  }
  func.func @transform_1(%arg0: i32) -> (i32, i32) {
    %c0_i32 = arith.constant 0 : i32
    %c0_i32_0 = arith.constant 0 : i32
    %c0_i32_1 = arith.constant 0 : i32
    return %c0_i32, %c0_i32_0 : i32, i32
  }
  func.func @transform_2(%arg0: i32) -> (i32, i32) {
    %c0_i32 = arith.constant 0 : i32
    %c0_i32_0 = arith.constant 0 : i32
    %c0_i32_1 = arith.constant 0 : i32
    return %c0_i32, %c0_i32_0 : i32, i32
  }
  func.func @transform_3(%arg0: i32) -> (i32, i32) {
    %c0_i32 = arith.constant 0 : i32
    %c0_i32_0 = arith.constant 0 : i32
    %c0_i32_1 = arith.constant 0 : i32
    return %c0_i32, %c0_i32_0 : i32, i32
  }
  func.func @transform_4(%arg0: i32) -> (i32, i32) {
    %c0_i32 = arith.constant 0 : i32
    %c0_i32_0 = arith.constant 0 : i32
    %c0_i32_1 = arith.constant 0 : i32
    return %c0_i32, %c0_i32_0 : i32, i32
  }
  func.func @transform_5(%arg0: i32) -> (i32, i32) {
    %c0_i32 = arith.constant 0 : i32
    %c0_i32_0 = arith.constant 0 : i32
    %c0_i32_1 = arith.constant 0 : i32
    return %c0_i32, %c0_i32_0 : i32, i32
  }
  func.func @transform_6(%arg0: i32) -> (i32, i32) {
    %c0_i32 = arith.constant 0 : i32
    %c0_i32_0 = arith.constant 0 : i32
    return %arg0, %c0_i32 : i32, i32
  }
}

</mosaic_0001>

<bundles_post_ra>
// kernel: tpu_custom_call.1
= control target key start
LH: loop header
LB: loop body
LE: loop exit
PB: predicated region body
PF: predicated region fallthrough
CT: control target
= control target key end

     0   :  { %s1903_s21 = smov 0   ;;  %s2800_s0 = inlined_call_operand.vmem [shape: f32[256,64], index: 0, kind: input, shape index: {}]   ;;  %s2801_s1 = inlined_call_operand.vmem [shape: bf16[64,256], index: 1, kind: input, shape index: {}]   ;;  %s2802_s2 = inlined_call_operand.vmem [shape: f32[15,128], index: 2, kind: input, shape index: {}]   ;;  %s2803_s3 = inlined_call_operand.vmem [shape: bf16[128,64], index: 3, kind: input, shape index: {}]   ;;  %s2804_s4 = inlined_call_operand.vmem [shape: f32[8,128], index: 4, kind: input, shape index: {}]   ;;  %s2805_s5 = inlined_call_operand.vmem [shape: f32[1,64], index: 5, kind: input, shape index: {}]   ;;  %s2806_s6 = inlined_call_operand.vmem [shape: bf16[256,64], index: 6, kind: output, shape index: {}]  }
   0x1 LB: > { %s1706_s22 = sadd.s32 4294967295, %s1865_s21   ;;  %p1710_p0 = scmp.ge.s32.totalorder %s1865_s21, 1  ;;  %s1865_s21 = sphi %s1903_s21, %s16_s21  }
   0x2   : > { %p213_p1 = scmp.lt.s32.totalorder %s1865_s21, 5 }
   0x4   : > { %p214_p2 = pnand %p1710_p0, %p213_p1 }
   0x6   : > { %217 = sbr.rel (%p214_p2) target bundleno = 694 (0x2b6), region = 44 }
   0xd   : > { %v1807_v0 = vld [vmem:[%s2801_s1 + $0x4] ss:$8 sps:$4 sm:$0xff]   ;;  %s1711_s25 = sshll.u32 %s1706_s22, 3  ;;  %v1809_v1 = vld [vmem:[%s2801_s1] ss:$8 sps:$4 sm:$0xff]   ;;  %v1867_v2 = vmov 0   ;;  %v422_v28 = vlaneseq }
   0xe   : > { %381 = vmatprep.mubr.bf16.mxu0 %v1867_v2  ;;  %506 = vst [vmem:[#allocation2] sm:$0xf] %v1867_v2  ;;  %507 = vst [vmem:[#allocation2 + $0x20] sm:$0xf0] %v1867_v2  ;;  %p244_p3 = scmp.lt.s32.totalorder %s1711_s25, 31  ;;  %349 = vmatprep.subr.bf16.mxu0 %v1807_v0  ;;  %vm336_vm0 = vcmask 523264  }
   0xf   : > { %v1810_v3 = vld [vmem:[%s2801_s1 + $0x14] ss:$8 sps:$4 sm:$0xff]   ;;  %350 = vmatpush1.bf16.msra.mxu0 %v1809_v1  ;;  %v1812_v4 = vld [vmem:[%s2801_s1 + $0x10] ss:$8 sps:$4 sm:$0xff]   ;;  %v1813_v5 = vld [vmem:[%s2801_s1 + $0x24] ss:$8 sps:$4 sm:$0xff]  }
  0x10   : > { %s2873_s25 = smov (!%p244_p3, %s1711_s25), 31  ;;  %351 = vmatprep.subr.bf16.mxu0 %v1810_v3  ;;  %v1815_v6 = vld [vmem:[%s2801_s1 + $0x20] ss:$8 sps:$4 sm:$0xff]   ;;  %v1816_v7 = vld [vmem:[%s2801_s1 + $0x34] ss:$8 sps:$4 sm:$0xff]   ;;  %v1966_v29 = vshrl.u32 %v422_v28, 7 }
  0x11   : > { %s1712_s10 = sshll.u32 %s2873_s25, 3  ;;  %v1818_v8 = vld [vmem:[%s2801_s1 + $0x30] ss:$8 sps:$4 sm:$0xff]   ;;  %v1819_v21 = vld [vmem:[%s2803_s3] sm:$0xff]   ;;  %v1820_v22 = vld [vmem:[%s2803_s3 + $0x8] sm:$0xff]   ;;  %vm512_vm1 = vcmask 1043456  }
  0x12   : > { %s247_s13 = scalar_lea.vmem %s2800_s0, %s1712_s10  ;;  %1774 = vmatprep.subr.bf16.mxu1 %v1819_v21  ;;  %v1821_v23 = vld [vmem:[%s2803_s3 + $0x10] sm:$0xff]   ;;  %v1822_v24 = vld [vmem:[%s2803_s3 + $0x18] sm:$0xff]   ;;  %v1823_v25 = vld [vmem:[%s2803_s3 + $0x20] sm:$0xff]   ;;  %v1969_v30 = vsub.s32 1, %v1966_v29  ;;  %v424_v59 = vsub.s32 0, %v1966_v29  ;;  %vm595_vm2 = vcmask 1046528  }
  0x13   : > { %352 = vmatpush1.bf16.msra.mxu0 %v1812_v4  ;;  %v276_v9 = vld [vmem:[%s247_s13] sm:$0xff]  ;;  %v277_v10 = vld [vmem:[%s247_s13 + $0x8] sm:$0xff]  ;;  %v278_v12 = vld [vmem:[%s247_s13 + $0x10] sm:$0xff]  ;;  %1775 = vmatpush3.bf16.msra.mxu1 %v1819_v21  ;;  %vm655_vm3 = vcmask 1045504   ;;  %vm716_vm4 = vcmask 1044480   ;;  %vm837_vm5 = vcmask 1042432  }
  0x14   : > { %353 = vmatprep.subr.bf16.mxu0 %v1813_v5  ;;  %v284_v11 = vpack.c.bf16 %v277_v10, %v276_v9  ;;  %v279_v13 = vld [vmem:[%s247_s13 + $0x18] sm:$0xff]  ;;  %v280_v15 = vld [vmem:[%s247_s13 + $0x20] sm:$0xff]  ;;  %v281_v16 = vld [vmem:[%s247_s13 + $0x28] sm:$0xff]  ;;  %1776 = vmatprep.subr.bf16.mxu1 %v1820_v22  ;;  %vm897_vm6 = vcmask 1041408   ;;  %vm980_vm7 = vcmask 1040384   ;;  %s1714_s23 = sshll.u32 %s2873_s25, 2 }
  0x15   : > { %v285_v14 = vpack.c.bf16 %v279_v13, %v278_v12  ;;  %v286_v17 = vpack.c.bf16 %v281_v16, %v280_v15  ;;  %v282_v18 = vld [vmem:[%s247_s13 + $0x30] sm:$0xff]  ;;  %v283_v19 = vld [vmem:[%s247_s13 + $0x38] sm:$0xff]  ;;  %v1824_v26 = vld [vmem:[%s2803_s3 + $0x28] sm:$0xff]   ;;  %vm1455_vm8 = vsmask.f32 7424  ;;  %s253_s27 = scalar_lea.vmem %s2806_s6, %s1714_s23  ;;  %vm1641_vm9 = vcmask 519168  }
  0x16   : > { %v287_v20 = vpack.c.bf16 %v283_v19, %v282_v18  ;;  %v1825_v27 = vld [vmem:[%s2803_s3 + $0x30] sm:$0xff]   ;;  %v1974_v31 = vld [vmem:[%s2804_s4] sm:$0xff]  ;;  %v1826_v40 = vld [vmem:[%s2803_s3 + $0x38] sm:$0xff]  }
  0x17   : > { %354 = vmatpush1.bf16.msra.mxu0 %v1815_v6  ;;  %1777 = vmatpush3.bf16.msra.mxu1 %v1820_v22  ;;  %v437_v32 = vrot.slane %v1974_v31, %v1969_v30  ;;  %v1989_v0 = vrot.slane %v1974_v31, %v424_v59  ;;  %v532_v22 = vsub.s32 2, %v1966_v29 }
  0x18   : > { %355 = vmatprep.subr.bf16.mxu0 %v1816_v7  ;;  %1778 = vmatprep.subr.bf16.mxu1 %v1821_v23 }
  0x1b   : > { %356 = vmatpush1.bf16.msra.mxu0 %v1818_v8  ;;  %1779 = vmatpush3.bf16.msra.mxu1 %v1821_v23 }
  0x1c   : > { %1780 = vmatprep.subr.bf16.mxu1 %v1822_v24 }
  0x1e   : > { %1723 = vmatmul.mubr.msk.bf16.vlgmr.msra.gmra.mrb[0].mxu0 %vm336_vm0, %v284_v11 }
  0x1f   : > { %391 = vmatprep.mubr.bf16.mxu0 %v1867_v2  ;;  %1781 = vmatpush3.bf16.msra.mxu1 %v1822_v24  ;;  %v256_v24 = vld [vmem:[%s2802_s2] sm:$0xff] }
  0x20   : > { %1782 = vmatprep.subr.bf16.mxu1 %v1823_v25 }
  0x23   : > { %1783 = vmatpush3.bf16.msra.mxu1 %v1823_v25  ;;  %v257_v25 = vld [vmem:[%s2802_s2 + $0x8] sm:$0x7f] }
  0x24   : > { %1784 = vmatprep.subr.bf16.mxu1 %v1824_v26 }
  0x26   : > { %1724 = vmatmul.mubr.msk.bf16.gmra.mrb[4].mxu0 %vm336_vm0, %v285_v14 }
  0x27   : > { %401 = vmatprep.mubr.bf16.mxu0 %v1867_v2  ;;  %1785 = vmatpush3.bf16.msra.mxu1 %v1824_v26 }
  0x28   : > { %1786 = vmatprep.subr.bf16.mxu1 %v1825_v27 }
  0x2b   : > { %1787 = vmatpush3.bf16.msra.mxu1 %v1825_v27 }
  0x2c   : > { %1788 = vmatprep.subr.bf16.mxu1 %v1826_v40 }
  0x2e   : > { %1725 = vmatmul.mubr.msk.bf16.gmra.mrb[8].mxu0 %vm336_vm0, %v286_v17 }
  0x2f   : > { %411 = vmatprep.mubr.bf16.mxu0 %v1867_v2  ;;  %1789 = vmatpush3.bf16.msra.mxu1 %v1826_v40  ;;  %v2013_v40 = vrot.slane %v1974_v31, %v532_v22 }
  0x36   : > { %1726 = vmatmul.mubr.msk.bf16.gmra.mrb[12].mxu0 %vm336_vm0, %v287_v20 }
  0xf1   : > { %v383_v33 = vpop.f32.mrb[0].mxu0 }
  0xf2   : > { %v385_v34 = vpop.f32.mrb[1].mxu0  ;;  %v426_v9 = vadd.f32 %v1989_v0, %v383_v33  ;;  %v756_v33 = vsub.s32 4, %v1966_v29 }
  0xf3   : > { %v438_v35 = vadd.f32 %v437_v32, %v385_v34  ;;  %v387_v36 = vpop.f32.mrb[2].mxu0  ;;  %v817_v34 = vsub.s32 5, %v1966_v29 }
  0xf4   : > { %v389_v37 = vpop.f32.mrb[3].mxu0  ;;  %v427_v14 = vadd.f32 %v1989_v0, %v387_v36 }
  0xf5   : > { %v1727_v38 = vmul.f32 -1.442695, %v438_v35  ;;  %v439_v39 = vadd.f32 %v437_v32, %v389_v37  ;;  %v877_v37 = vsub.s32 6, %v1966_v29 }
  0xf7   : > { %1827 = vpow2.f32 %v1727_v38  ;;  %v1728_v41 = vmul.f32 -1.442695, %v439_v39  ;;  %v962_v38 = vsub.s32 7, %v1966_v29 }
  0xf9   : > { %1829 = vpow2.f32 %v1728_v41  ;;  %v393_v42 = vpop.f32.mrb[4].mxu0  ;;  %v2015_v41 = vrot.slane %v256_v24, %v424_v59 }
  0xfa   : > { %v395_v43 = vpop.f32.mrb[5].mxu0  ;;  %v428_v27 = vadd.f32 %v1989_v0, %v393_v42  ;;  %v2017_v42 = vrot.slane %v256_v24, %v532_v22 }
  0xfb   : > { %v440_v44 = vadd.f32 %v437_v32, %v395_v43  ;;  %v1981_v45 = vpop.f32.mrb[6].mxu0  ;;  %v2019_v43 = vrot.slane %v257_v25, %v424_v59 }
  0xfc   : > { %v399_v46 = vpop.f32.mrb[7].mxu0  ;;  %v429_v36 = vadd.f32 %v1989_v0, %v1981_v45  ;;  %v2027_v45 = vrot.slane %v257_v25, %v1969_v30 }
  0xfd   : > { %v1729_v47 = vmul.f32 -1.442695, %v440_v44  ;;  %v441_v48 = vadd.f32 %v437_v32, %v399_v46  ;;  %2837 = vst [vmem:[#allocation3_spill] sm:$0xff] %v2019_v43  ;;  %v2021_v46 = vrot.slane %v257_v25, %v532_v22 }
  0xff   : > { %1831 = vpow2.f32 %v1729_v47  ;;  %v1730_v49 = vmul.f32 -1.442695, %v441_v48  ;;  %v2024_v47 = vrot.slane %v256_v24, %v1969_v30 }
 0x101   : > { %v1828_v50 = vpop.eup %1827  ;;  %1833 = vpow2.f32 %v1730_v49  ;;  %v1983_v51 = vpop.f32.mrb[8].mxu0  ;;  %v2031_v49 = vrot.slane %v256_v24, %v756_v33 }
 0x102   : > { %v470_v52 = vadd.f32 1.0, %v1828_v50  ;;  %v405_v53 = vpop.f32.mrb[9].mxu0 }
 0x103   : > { %v1830_v54 = vpop.eup %1829  ;;  %v442_v55 = vadd.f32 %v437_v32, %v405_v53  ;;  %v1985_v56 = vpop.f32.mrb[10].mxu0  ;;  %v2033_v53 = vrot.slane %v256_v24, %v817_v34 }
 0x104   : > { %1835 = vrcp.f32 %v470_v52  ;;  %v471_v57 = vadd.f32 1.0, %v1830_v54  ;;  %v409_v58 = vpop.f32.mrb[11].mxu0  ;;  %v2035_v54 = vrot.slane %v256_v24, %v877_v37 }
 0x105   : > { %v1731_v60 = vmul.f32 -1.442695, %v442_v55  ;;  %v443_v61 = vadd.f32 %v437_v32, %v409_v58  ;;  %v2037_v55 = vrot.slane %v256_v24, %v962_v38  ;;  %v2041_v58 = vrot.slane %v257_v25, %v756_v33 }
 0x106   : > { %1837 = vrcp.f32 %v471_v57 }
 0x107   : > { %1839 = vpow2.f32 %v1731_v60  ;;  %v1732_v62 = vmul.f32 -1.442695, %v443_v61  ;;  %v430_v60 = vadd.f32 %v1989_v0, %v1983_v51  ;;  %v2045_v61 = vrot.slane %v257_v25, %v817_v34 }
 0x109   : > { %v1832_v63 = vpop.eup %1831  ;;  %1841 = vpow2.f32 %v1732_v62  ;;  %v1991_v1 = vpop.f32.mrb[12].mxu0  ;;  %v2047_v62 = vrot.slane %v257_v25, %v877_v37 }
 0x10a   : > { %v472_v2 = vadd.f32 1.0, %v1832_v63  ;;  %v415_v3 = vpop.f32.mrb[13].mxu0 }
 0x10b   : > { %v1834_v4 = vpop.eup %1833  ;;  %v444_v5 = vadd.f32 %v437_v32, %v415_v3  ;;  %v1993_v6 = vpop.f32.mrb[14].mxu0  ;;  %v432_v3 = vadd.f32 %v1989_v0, %v1991_v1 }
 0x10c   : > { %1843 = vrcp.f32 %v472_v2  ;;  %v473_v7 = vadd.f32 1.0, %v1834_v4  ;;  %v419_v8 = vpop.f32.mrb[15].mxu0  ;;  %v431_v2 = vadd.f32 %v1989_v0, %v1985_v56  ;;  %v433_v4 = vadd.f32 %v1989_v0, %v1993_v6 }
 0x10d   : > { %v1733_v10 = vmul.f32 -1.442695, %v444_v5  ;;  %v445_v11 = vadd.f32 %v437_v32, %v419_v8  ;;  %v696_v32 = vsub.s32 3, %v1966_v29 }
 0x10e   : > { %v1836_v12 = vpop.eup %1835  ;;  %1845 = vrcp.f32 %v473_v7 }
 0x10f   : > { %v494_v13 = vmul.f32 %v1836_v12, %v426_v9  ;;  %1847 = vpow2.f32 %v1733_v10  ;;  %v1734_v15 = vmul.f32 -1.442695, %v445_v11  ;;  %v2029_v31 = vrot.slane %v256_v24, %v696_v32 }
 0x110   : > { %v1838_v16 = vpop.eup %1837  ;;  %v2039_v30 = vrot.slane %v257_v25, %v696_v32 }
 0x111   : > { %v1840_v17 = vpop.eup %1839  ;;  %v495_v18 = vmul.f32 %v1838_v16, %v427_v14  ;;  %1849 = vpow2.f32 %v1734_v15 }
 0x112   : > { %v474_v19 = vadd.f32 1.0, %v1840_v17 }
 0x113   : > { %v1842_v20 = vpop.eup %1841  ;;  %v502_v21 = vpack.c.bf16 %v495_v18, %v494_v13 }
 0x114   : > { %1851 = vrcp.f32 %v474_v19  ;;  %v475_v23 = vadd.f32 1.0, %v1842_v20 }
 0x115   : > { %v513_v26 = vrot.slane %v502_v21, 4 }
 0x116   : > { %v1844_v28 = vpop.eup %1843  ;;  %1853 = vrcp.f32 %v475_v23 }
 0x117   : > { %525 = vst [vmem:[#allocation2] sm:$0xf0] %v513_v26  ;;  %v496_v35 = vmul.f32 %v1844_v28, %v428_v27 }
 0x118   : > { %v1846_v39 = vpop.eup %1845 }
 0x119   : > { %v1848_v44 = vpop.eup %1847  ;;  %v497_v29 = vmul.f32 %v1846_v39, %v429_v36 }
 0x11a   : > { %v476_v48 = vadd.f32 1.0, %v1848_v44 }
 0x11b   : > { %v1850_v50 = vpop.eup %1849  ;;  %v503_v52 = vpack.c.bf16 %v497_v29, %v496_v35 }
 0x11c   : > { %1855 = vrcp.f32 %v476_v48  ;;  %v477_v57 = vadd.f32 1.0, %v1850_v50 }
 0x11d   : > { %v514_v59 = vrot.slane %v503_v52, 4 }
 0x11e   : > { %v1852_v63 = vpop.eup %1851  ;;  %1857 = vrcp.f32 %v477_v57  ;;  %v534_v5 = vld [vmem:[#allocation2] sm:$0xff] }
 0x11f   : > { %v570_v7 = vld [vmem:[#allocation2] sm:$0xfe]  ;;  %v2058_v51 = vsel %vm512_vm1, %v513_v26, %v514_v59  ;;  %v498_v9 = vmul.f32 %v1852_v63, %v430_v60  ;;  %v539_v10 = vunpack.c.l.bf16 %v534_v5  ;;  %v540_v11 = vunpack.c.h.bf16 %v534_v5 }
 0x120   : > { %v2055_v8 = vld [vmem:[#allocation2] sm:$0xfc]  ;;  %v1854_v12 = vpop.eup %1853  ;;  %v2061_v56 = vunpack.c.l.bf16 %v2058_v51  ;;  %v2064_v1 = vunpack.c.h.bf16 %v2058_v51  ;;  %v571_v13 = vunpack.c.l.bf16 %v570_v7  ;;  %v572_v0 = vunpack.c.h.bf16 %v570_v7 }
 0x121   : > { %v499_v6 = vmul.f32 %v1854_v12, %v431_v2  ;;  %v552_v14 = vmul.f32 %v2015_v41, %v539_v10  ;;  %v553_v15 = vmul.f32 %v2015_v41, %v540_v11  ;;  %v692_v16 = vunpack.c.l.bf16 %v2055_v8 }
 0x122   : > { %v554_v17 = vmul.f32 %v2015_v41, %v2061_v56  ;;  %v555_v18 = vmul.f32 %v2015_v41, %v2064_v1  ;;  %v577_v19 = vmul.f32 %v2024_v47, %v571_v13  ;;  %v578_v20 = vmul.f32 %v2024_v47, %v572_v0 }
 0x123   : > { %v504_v21 = vpack.c.bf16 %v499_v6, %v498_v9  ;;  %v561_v22 = vadd.f32 %v552_v14, %v2013_v40  ;;  %v562_v23 = vadd.f32 %v553_v15, %v2013_v40  ;;  %v579_v24 = vmul.f32 %v2024_v47, %v2061_v56 }
 0x124   : > { %v563_v25 = vadd.f32 %v554_v17, %v2013_v40  ;;  %v564_v26 = vadd.f32 %v555_v18, %v2013_v40  ;;  %v580_v27 = vmul.f32 %v2024_v47, %v2064_v1  ;;  %v596_v28 = vrot.slane %v577_v19, 1 }
 0x125   : > { %v516_v32 = vrot.slane %v504_v21, 4  ;;  %v597_v33 = vrot.slane %v578_v20, 1  ;;  %v599_v34 = vrot.slane %v579_v24, 1  ;;  %v637_v35 = vmul.f32 %v2017_v42, %v571_v13 }
 0x126   : > { %v1856_v36 = vpop.eup %1855  ;;  %v601_v37 = vrot.slane %v580_v27, 1  ;;  %v638_v38 = vmul.f32 %v2017_v42, %v572_v0  ;;  %v639_v39 = vmul.f32 %v2017_v42, %v2061_v56  ;;  %v640_v44 = vmul.f32 %v2017_v42, %v2064_v1 }
 0x127   : > { %v2090_v29 = vsel %vm512_vm1, %v514_v59, %v516_v32  ;;  %v500_v48 = vmul.f32 %v1856_v36, %v432_v3  ;;  %v598_v50 = vsel %vm595_vm2, %v596_v28, %v597_v33  ;;  %v600_v52 = vsel %vm595_vm2, %v597_v33, %v599_v34 }
 0x128   : > { %v1858_v57 = vpop.eup %1857  ;;  %v2095_v60 = vunpack.c.l.bf16 %v2090_v29  ;;  %v2098_v63 = vunpack.c.h.bf16 %v2090_v29  ;;  %v602_v2 = vsel %vm595_vm2, %v599_v34, %v601_v37  ;;  %v622_v5 = vadd.f32 %v598_v50, %v561_v22 }
 0x129   : > { %v501_v7 = vmul.f32 %v1858_v57, %v433_v4  ;;  %v623_v9 = vadd.f32 %v600_v52, %v562_v23  ;;  %v624_v59 = vadd.f32 %v602_v2, %v563_v25  ;;  %v656_v10 = vrot.slane %v637_v35, 2 }
 0x12a   : > { %v2103_v3 = vmul.f32 %v2024_v47, %v2095_v60  ;;  %v2107_v11 = vmul.f32 %v2017_v42, %v2095_v60  ;;  %v657_v12 = vrot.slane %v638_v38, 2  ;;  %v659_v13 = vrot.slane %v639_v39, 2 }
 0x12b   : > { %v505_v0 = vpack.c.bf16 %v501_v7, %v500_v48  ;;  %v661_v6 = vrot.slane %v640_v44, 2  ;;  %v693_v14 = vunpack.c.h.bf16 %v2055_v8  ;;  %v698_v4 = vmul.f32 %v2029_v31, %v692_v16 }
 0x12c   : > { %v2812_v15 = vrot.slane %v2103_v3, 1  ;;  %v658_v17 = vsel %vm655_vm3, %v656_v10, %v657_v12  ;;  %v660_v18 = vsel %vm655_vm3, %v657_v12, %v659_v13  ;;  %v2811_v19 = vrot.slane %v2107_v11, 2  ;;  %v812_v12 = vld [vmem:[#allocation2] sm:$0xf8] }
 0x12d   : > { %v518_v20 = vrot.slane %v505_v0, 4  ;;  %v662_v21 = vsel %vm655_vm3, %v659_v13, %v661_v6  ;;  %v682_v22 = vadd.f32 %v658_v17, %v622_v5  ;;  %v683_v23 = vadd.f32 %v660_v18, %v623_v9 }
 0x12e   : > { %v604_v24 = vsel %vm595_vm2, %v601_v37, %v2812_v15  ;;  %v664_v25 = vsel %vm655_vm3, %v661_v6, %v2811_v19  ;;  %v684_v27 = vadd.f32 %v662_v21, %v624_v59  ;;  %v699_v28 = vmul.f32 %v2029_v31, %v693_v14 }
 0x12f   : > { %v519_v33 = vsel %vm512_vm1, %v516_v32, %v518_v20  ;;  %529 = vst [vmem:[#allocation2 + $0x20] sm:$0xf] %v518_v20  ;;  %v625_v34 = vadd.f32 %v604_v24, %v564_v26  ;;  %v700_v35 = vmul.f32 %v2029_v31, %v2061_v56  ;;  %v701_v36 = vmul.f32 %v2029_v31, %v2064_v1 }
 0x130   : > { %v2130_v38 = vunpack.c.l.bf16 %v519_v33  ;;  %v2132_v37 = vunpack.c.h.bf16 %v519_v33  ;;  %v2134_v39 = vrot.slane %v519_v33, 4  ;;  %v2138_v44 = vmul.f32 %v2029_v31, %v2095_v60 }
 0x131   : > { %v685_v48 = vadd.f32 %v664_v25, %v625_v34  ;;  %v717_v32 = vrot.slane %v698_v4, 3  ;;  %v718_v50 = vrot.slane %v699_v28, 3  ;;  %v720_v26 = vrot.slane %v700_v35, 3 }
 0x132   : > { %2838 = vst [vmem:[#allocation4_spill] sm:$0xff] %v2132_v37  ;;  %v722_v52 = vrot.slane %v701_v36, 3  ;;  %v2810_v57 = vrot.slane %v2138_v44, 3  ;;  %v758_v2 = vmul.f32 %v2031_v49, %v692_v16  ;;  %v759_v5 = vmul.f32 %v2031_v49, %v693_v14 }
 0x133   : > { %v719_v7 = vsel %vm716_vm4, %v717_v32, %v718_v50  ;;  %v721_v9 = vsel %vm716_vm4, %v718_v50, %v720_v26  ;;  %v760_v59 = vmul.f32 %v2031_v49, %v2061_v56  ;;  %v761_v10 = vmul.f32 %v2031_v49, %v2064_v1 }
 0x134   : > { %v723_v13 = vsel %vm716_vm4, %v720_v26, %v722_v52  ;;  %v725_v8 = vsel %vm716_vm4, %v722_v52, %v2810_v57  ;;  %v743_v16 = vadd.f32 %v719_v7, %v682_v22  ;;  %v744_v0 = vadd.f32 %v721_v9, %v683_v23 }
 0x135   : > { %v745_v6 = vadd.f32 %v723_v13, %v684_v27  ;;  %v746_v14 = vadd.f32 %v725_v8, %v685_v48  ;;  %v2157_v4 = vmul.f32 %v2031_v49, %v2095_v60  ;;  %v777_v17 = vrot.slane %v758_v2, 4 }
 0x136   : > { %v778_v18 = vrot.slane %v759_v5, 4  ;;  %v780_v20 = vrot.slane %v760_v59, 4  ;;  %v782_v21 = vrot.slane %v761_v10, 4  ;;  %v813_v24 = vunpack.c.l.bf16 %v812_v12 }
 0x137   : > { %v2809_v25 = vrot.slane %v2157_v4, 4  ;;  %v814_v28 = vunpack.c.h.bf16 %v812_v12  ;;  %v821_v33 = vmul.f32 %v2033_v53, %v2061_v56  ;;  %v822_v22 = vmul.f32 %v2033_v53, %v2064_v1 }
 0x138   : > { %v779_v23 = vsel %vm512_vm1, %v777_v17, %v778_v18  ;;  %v781_v27 = vsel %vm512_vm1, %v778_v18, %v780_v20  ;;  %v783_v34 = vsel %vm512_vm1, %v780_v20, %v782_v21  ;;  %v819_v35 = vmul.f32 %v2033_v53, %v813_v24  ;;  %v933_v18 = vld [vmem:[#allocation2] sm:$0xf0] }
 0x139   : > { %v785_v36 = vsel %vm512_vm1, %v782_v21, %v2809_v25  ;;  %v803_v48 = vadd.f32 %v779_v23, %v743_v16  ;;  %v804_v32 = vadd.f32 %v781_v27, %v744_v0  ;;  %v805_v50 = vadd.f32 %v783_v34, %v745_v6  ;;  %v2194_v27 = vld [vmem:[#allocation2] sm:$0xc0] }
 0x13a   : > { %v806_v26 = vadd.f32 %v785_v36, %v746_v14  ;;  %v820_v52 = vmul.f32 %v2033_v53, %v814_v28  ;;  %v2174_v2 = vmul.f32 %v2033_v53, %v2095_v60  ;;  %v838_v5 = vrot.slane %v819_v35, 5 }
 0x13b   : > { %v841_v7 = vrot.slane %v821_v33, 5  ;;  %v843_v9 = vrot.slane %v822_v22, 5  ;;  %v879_v59 = vmul.f32 %v2035_v54, %v813_v24  ;;  %v880_v10 = vmul.f32 %v2035_v54, %v814_v28  ;;  %v1045_v28 = vld [vmem:[#allocation2] sm:$0xe0] }
 0x13c   : > { %v839_v12 = vrot.slane %v820_v52, 5  ;;  %v2808_v13 = vrot.slane %v2174_v2, 5  ;;  %v881_v8 = vmul.f32 %v2035_v54, %v2061_v56  ;;  %v882_v16 = vmul.f32 %v2035_v54, %v2064_v1 }
 0x13d   : > { %v844_v0 = vsel %vm837_vm5, %v841_v7, %v843_v9  ;;  %v2186_v6 = vmul.f32 %v2035_v54, %v2095_v60  ;;  %v898_v14 = vrot.slane %v879_v59, 6  ;;  %v899_v17 = vrot.slane %v880_v10, 6 }
 0x13e   : > { %v840_v20 = vsel %vm837_vm5, %v838_v5, %v839_v12  ;;  %v842_v21 = vsel %vm837_vm5, %v839_v12, %v841_v7  ;;  %v846_v56 = vsel %vm837_vm5, %v843_v9, %v2808_v13  ;;  %v866_v24 = vadd.f32 %v844_v0, %v805_v50 }
 0x13f   : > { %v864_v1 = vadd.f32 %v840_v20, %v803_v48  ;;  %v865_v33 = vadd.f32 %v842_v21, %v804_v32  ;;  %v867_v22 = vadd.f32 %v846_v56, %v806_v26  ;;  %v900_v23 = vsel %vm897_vm6, %v898_v14, %v899_v17 }
 0x140   : > { %v901_v34 = vrot.slane %v881_v8, 6  ;;  %v903_v35 = vrot.slane %v882_v16, 6  ;;  %v2807_v36 = vrot.slane %v2186_v6, 6  ;;  %v939_v52 = vrot.slane %v933_v18, 4 }
 0x141   : > { %v924_v5 = vadd.f32 %v900_v23, %v864_v1  ;;  %v2198_v7 = vrot.slane %v2058_v51, 4  ;;  %v942_v50 = vrot.slane %v2090_v29, 4  ;;  %v1047_v9 = vrot.slane %v1045_v28, 4 }
 0x142   : > { %v902_v48 = vsel %vm897_vm6, %v899_v17, %v901_v34  ;;  %v904_v32 = vsel %vm897_vm6, %v901_v34, %v903_v35  ;;  %v906_v26 = vsel %vm897_vm6, %v903_v35, %v2807_v36 }
 0x143   : > { %v925_v10 = vadd.f32 %v902_v48, %v865_v33  ;;  %v926_v12 = vadd.f32 %v904_v32, %v866_v24  ;;  %v927_v8 = vadd.f32 %v906_v26, %v867_v22  ;;  %v941_v51 = vsel %vm512_vm1, %v939_v52, %v2198_v7 }
 0x144   : > { %v943_v29 = vsel %vm512_vm1, %v2198_v7, %v942_v50  ;;  %v2213_v16 = vsel %vm512_vm1, %v942_v50, %v2134_v39  ;;  %v952_v0 = vunpack.c.l.bf16 %v941_v51  ;;  %v953_v14 = vunpack.c.h.bf16 %v941_v51 }
 0x145   : > { %v2215_v17 = vunpack.c.l.bf16 %v943_v29  ;;  %v2217_v18 = vunpack.c.h.bf16 %v943_v29  ;;  %v2220_v20 = vunpack.c.l.bf16 %v2213_v16  ;;  %v1048_v21 = vsel %vm512_vm1, %v1047_v9, %v2198_v7 }
 0x146   : > { %v964_v56 = vmul.f32 %v2037_v55, %v952_v0  ;;  %v965_v24 = vmul.f32 %v2037_v55, %v953_v14  ;;  %v1027_v28 = vmul.f32 %v2019_v43, %v952_v0  ;;  %v1028_v1 = vmul.f32 %v2019_v43, %v953_v14 }
 0x147   : > { %v966_v33 = vmul.f32 %v2037_v55, %v2215_v17  ;;  %v2232_v22 = vmul.f32 %v2037_v55, %v2217_v18  ;;  %v1029_v23 = vmul.f32 %v2019_v43, %v2215_v17  ;;  %v1030_v34 = vmul.f32 %v2019_v43, %v2217_v18 }
 0x148   : > { %v981_v35 = vrot.slane %v964_v56, 7  ;;  %v982_v52 = vrot.slane %v965_v24, 7  ;;  %v1050_v50 = vunpack.c.l.bf16 %v1048_v21  ;;  %v1051_v9 = vunpack.c.h.bf16 %v1048_v21 }
 0x149   : > { %2839 = vst [vmem:[#allocation5_spill] sm:$0xff] %v2232_v22  ;;  %v984_v48 = vrot.slane %v966_v33, 7  ;;  %v986_v32 = vrot.slane %v2232_v22, 7  ;;  %v1058_v26 = vmul.f32 %v2027_v45, %v2215_v17  ;;  %v1059_v51 = vmul.f32 %v2027_v45, %v2217_v18 }
 0x14a   : > { %v983_v29 = vsel %vm980_vm7, %v981_v35, %v982_v52  ;;  %v1005_v0 = vadd.f32 %v981_v35, %v924_v5  ;;  %v1056_v14 = vmul.f32 %v2027_v45, %v1050_v50  ;;  %v1057_v36 = vmul.f32 %v2027_v45, %v1051_v9 }
 0x14b   : > { %v985_v56 = vsel %vm980_vm7, %v982_v52, %v984_v48  ;;  %v987_v21 = vsel %vm980_vm7, %v984_v48, %v986_v32  ;;  %v1006_v24 = vadd.f32 %v983_v29, %v925_v10  ;;  %v2252_v33 = vmul.f32 %v2027_v45, %v2220_v20 }
 0x14c   : > { %v1007_v13 = vadd.f32 %v985_v56, %v926_v12  ;;  %v1008_v25 = vadd.f32 %v987_v21, %v927_v8  ;;  %v1036_v57 = vadd.f32 %v1027_v28, %v1005_v0  ;;  %v1074_v19 = vrot.slane %v1056_v14, 1 }
 0x14d   : > { %v1037_v5 = vadd.f32 %v1028_v1, %v1006_v24  ;;  %v1075_v35 = vrot.slane %v1057_v36, 1  ;;  %v1077_v15 = vrot.slane %v1058_v26, 1  ;;  %v1079_v59 = vrot.slane %v1059_v51, 1 }
 0x14e   : > { %v1038_v37 = vadd.f32 %v1029_v23, %v1007_v13  ;;  %v1039_v43 = vadd.f32 %v1030_v34, %v1008_v25  ;;  %v1081_v52 = vrot.slane %v2252_v33, 1  ;;  %v1122_v22 = vmul.f32 %v2021_v46, %v1050_v50 }
 0x14f   : > { %v1076_v10 = vsel %vm595_vm2, %v1074_v19, %v1075_v35  ;;  %v1078_v48 = vsel %vm595_vm2, %v1075_v35, %v1077_v15  ;;  %v1080_v29 = vsel %vm595_vm2, %v1077_v15, %v1079_v59  ;;  %v1123_v12 = vmul.f32 %v2021_v46, %v1051_v9 }
 0x150   : > { %v1082_v36 = vsel %vm595_vm2, %v1079_v59, %v1081_v52  ;;  %v1100_v8 = vadd.f32 %v1076_v10, %v1036_v57  ;;  %v1101_v28 = vadd.f32 %v1078_v48, %v1037_v5  ;;  %v1102_v13 = vadd.f32 %v1080_v29, %v1038_v37 }
 0x151   : > { %v1103_v25 = vadd.f32 %v1082_v36, %v1039_v43  ;;  %v1124_v1 = vmul.f32 %v2021_v46, %v2215_v17  ;;  %v1125_v19 = vmul.f32 %v2021_v46, %v2217_v18  ;;  %v2269_v23 = vmul.f32 %v2021_v46, %v2220_v20 }
 0x152   : > { %v1140_v15 = vrot.slane %v1122_v22, 2  ;;  %v1141_v34 = vrot.slane %v1123_v12, 2  ;;  %v2840_v50 = vrot.slane %v2194_v27, 4  ;;  %v1188_v43 = vmul.f32 %v2039_v30, %v2215_v17 }
 0x153   : > { %v1143_v37 = vrot.slane %v1124_v1, 2  ;;  %v1145_v59 = vrot.slane %v1125_v19, 2  ;;  %v1147_v9 = vrot.slane %v2269_v23, 2  ;;  %v1189_v22 = vmul.f32 %v2039_v30, %v2217_v18 }
 0x154   : > { %v1178_v57 = vsel %vm512_vm1, %v2840_v50, %v2198_v7  ;;  %v1142_v51 = vsel %vm655_vm3, %v1140_v15, %v1141_v34  ;;  %v2283_v14 = vmul.f32 %v2039_v30, %v2220_v20  ;;  %v1207_v12 = vrot.slane %v1188_v43, 3 }
 0x155   : > { %v1180_v26 = vunpack.c.l.bf16 %v1178_v57  ;;  %v1181_v0 = vunpack.c.h.bf16 %v1178_v57  ;;  %v1144_v27 = vsel %vm655_vm3, %v1141_v34, %v1143_v37  ;;  %v1146_v56 = vsel %vm655_vm3, %v1143_v37, %v1145_v59 }
 0x156   : > { %v1148_v21 = vsel %vm655_vm3, %v1145_v59, %v1147_v9  ;;  %v1166_v24 = vadd.f32 %v1142_v51, %v1100_v8  ;;  %v1167_v5 = vadd.f32 %v1144_v27, %v1101_v28  ;;  %v1168_v35 = vadd.f32 %v1146_v56, %v1102_v13 }
 0x157   : > { %v1169_v10 = vadd.f32 %v1148_v21, %v1103_v25  ;;  %v1186_v48 = vmul.f32 %v2039_v30, %v1180_v26  ;;  %v1187_v29 = vmul.f32 %v2039_v30, %v1181_v0  ;;  %v1209_v36 = vrot.slane %v1189_v22, 3 }
 0x158   : > { %v2818_v1 = vrot.slane %v2283_v14, 3  ;;  %v1252_v15 = vmul.f32 %v2041_v58, %v1180_v26  ;;  %v1253_v34 = vmul.f32 %v2041_v58, %v1181_v0  ;;  %v1254_v50 = vmul.f32 %v2041_v58, %v2215_v17  ;;  %v1305_v26 = vld [vmem:[#allocation2] sm:$0x80] }
 0x159   : > { %v1204_v19 = vrot.slane %v1186_v48, 3  ;;  %v1205_v8 = vrot.slane %v1187_v29, 3  ;;  %v1210_v28 = vsel %vm716_vm4, %v1207_v12, %v1209_v36  ;;  %v1255_v25 = vmul.f32 %v2041_v58, %v2217_v18 }
 0x15a   : > { %v1212_v13 = vsel %vm716_vm4, %v1209_v36, %v2818_v1  ;;  %v1232_v57 = vadd.f32 %v1210_v28, %v1168_v35  ;;  %v2305_v37 = vmul.f32 %v2041_v58, %v2220_v20  ;;  %v1270_v59 = vrot.slane %v1252_v15, 4 }
 0x15b   : > { %v1233_v43 = vadd.f32 %v1212_v13, %v1169_v10  ;;  %v1206_v51 = vsel %vm716_vm4, %v1204_v19, %v1205_v8  ;;  %v1208_v0 = vsel %vm716_vm4, %v1205_v8, %v1207_v12  ;;  %v1271_v22 = vrot.slane %v1253_v34, 4 }
 0x15c   : > { %v1273_v27 = vrot.slane %v1254_v50, 4  ;;  %v1230_v56 = vadd.f32 %v1206_v51, %v1166_v24  ;;  %v1231_v21 = vadd.f32 %v1208_v0, %v1167_v5  ;;  %v1275_v48 = vrot.slane %v1255_v25, 4 }
 0x15d   : > { %v2817_v29 = vrot.slane %v2305_v37, 4  ;;  %v1272_v35 = vsel %vm512_vm1, %v1270_v59, %v1271_v22  ;;  %v1307_v36 = vrot.slane %v1305_v26, 4  ;;  %v1318_v15 = vmul.f32 %v2045_v61, %v2215_v17 }
 0x15e   : > { %v1274_v10 = vsel %vm512_vm1, %v1271_v22, %v1273_v27  ;;  %v1276_v28 = vsel %vm512_vm1, %v1273_v27, %v1275_v48  ;;  %v1296_v19 = vadd.f32 %v1272_v35, %v1230_v56  ;;  %v1319_v8 = vmul.f32 %v2045_v61, %v2217_v18 }
 0x15f   : > { %v1278_v12 = vsel %vm512_vm1, %v1275_v48, %v2817_v29  ;;  %v1297_v24 = vadd.f32 %v1274_v10, %v1231_v21  ;;  %v1298_v5 = vadd.f32 %v1276_v28, %v1232_v57  ;;  %v1308_v50 = vsel %vm512_vm1, %v1307_v36, %v2198_v7 }
 0x160   : > { %v1299_v34 = vadd.f32 %v1278_v12, %v1233_v43  ;;  %v1310_v13 = vunpack.c.l.bf16 %v1308_v50  ;;  %v1311_v25 = vunpack.c.h.bf16 %v1308_v50  ;;  %v2324_v59 = vmul.f32 %v2045_v61, %v2220_v20 }
 0x161   : > { %v1337_v26 = vrot.slane %v1318_v15, 5  ;;  %v1339_v51 = vrot.slane %v1319_v8, 5  ;;  %v1384_v0 = vmul.f32 %v2047_v62, %v2215_v17  ;;  %v1385_v57 = vmul.f32 %v2047_v62, %v2217_v18 }
 0x162   : > { %v2332_v7 = vmul.f32 %v2047_v62, %v2220_v20  ;;  %v1316_v43 = vmul.f32 %v2045_v61, %v1310_v13  ;;  %v1317_v22 = vmul.f32 %v2045_v61, %v1311_v25  ;;  %v1341_v27 = vrot.slane %v2324_v59, 5 }
 0x163   : > { %v1382_v56 = vmul.f32 %v2047_v62, %v1310_v13  ;;  %v1340_v21 = vsel %vm837_vm5, %v1337_v26, %v1339_v51  ;;  %v1383_v48 = vmul.f32 %v2047_v62, %v1311_v25  ;;  %v1403_v17 = vrot.slane %v1384_v0, 6 }
 0x164   : > { %v1405_v35 = vrot.slane %v1385_v57, 6  ;;  %v1334_v10 = vrot.slane %v1316_v43, 5  ;;  %v1335_v18 = vrot.slane %v1317_v22, 5  ;;  %v1342_v36 = vsel %vm837_vm5, %v1339_v51, %v1341_v27 }
 0x165   : > { %v1362_v15 = vadd.f32 %v1340_v21, %v1298_v5  ;;  %v1363_v28 = vadd.f32 %v1342_v36, %v1299_v34  ;;  %v1400_v12 = vrot.slane %v1382_v56, 6  ;;  %v1401_v50 = vrot.slane %v1383_v48, 6 }
 0x166   : > { %v1406_v8 = vsel %vm897_vm6, %v1403_v17, %v1405_v35  ;;  %v1336_v13 = vsel %vm837_vm5, %v1334_v10, %v1335_v18  ;;  %v1338_v29 = vsel %vm837_vm5, %v1335_v18, %v1337_v26  ;;  %v2831_v25 = vrot.slane %v2332_v7, 6 }
 0x167   : > { %v1428_v0 = vadd.f32 %v1406_v8, %v1362_v15  ;;  %v1360_v57 = vadd.f32 %v1336_v13, %v1296_v19  ;;  %v1361_v43 = vadd.f32 %v1338_v29, %v1297_v24  ;;  %v1402_v22 = vsel %vm897_vm6, %v1400_v12, %v1401_v50 }
 0x168   : > { %v1404_v1 = vsel %vm897_vm6, %v1401_v50, %v1403_v17  ;;  %v1408_v5 = vsel %vm897_vm6, %v1405_v35, %v2831_v25  ;;  %v556_v51 = vmul.f32 %v2015_v41, %v2095_v60  ;;  %v557_v26 = vmul.f32 %v2015_v41, %v2098_v63  ;;  %v2549_v25 = vld [vmem:[#allocation2 + $0x20] sm:$0x1] }
 0x169   : > { %v1437_v34 = vmax.f32 %v1428_v0, 0.0  ;;  %v1426_v56 = vadd.f32 %v1402_v22, %v1360_v57  ;;  %v1427_v21 = vadd.f32 %v1404_v1, %v1361_v43  ;;  %v1429_v48 = vadd.f32 %v1408_v5, %v1363_v28 }
 0x16a   : > { %v582_v29 = vmul.f32 %v2024_v47, %v2098_v63  ;;  %v565_v19 = vadd.f32 %v556_v51, %v2013_v40  ;;  %v566_v24 = vadd.f32 %v557_v26, %v2013_v40  ;;  %v2362_v17 = vmul.f32 %v2024_v47, %v2130_v38 }
 0x16b   : > { %v642_v60 = vmul.f32 %v2017_v42, %v2098_v63  ;;  %v1435_v35 = vmax.f32 %v1426_v56, 0.0  ;;  %v1436_v10 = vmax.f32 %v1427_v21, 0.0  ;;  %v1438_v18 = vmax.f32 %v1429_v48, 0.0 }
 0x16c   : > { %v605_v1 = vrot.slane %v582_v29, 1  ;;  %v2830_v36 = vrot.slane %v2362_v17, 1  ;;  %v2369_v15 = vmul.f32 %v2017_v42, %v2130_v38  ;;  %v703_v12 = vmul.f32 %v2029_v31, %v2098_v63 }
 0x16d   : > { %v665_v28 = vrot.slane %v642_v60, 2  ;;  %v1444_v50 = vpack.c.bf16 %v1436_v10, %v1435_v35  ;;  %v2373_v8 = vpack.c.bf16 %v1438_v18, %v1437_v34  ;;  %v2841_v13 = vrot.slane %v2103_v3, 1 }
 0x16e   : > { %v2380_v57 = vmul.f32 %v2029_v31, %v2130_v38  ;;  %v608_v43 = vsel %vm595_vm2, %v605_v1, %v2830_v36  ;;  %v2842_v5 = vrot.slane %v2107_v11, 2  ;;  %v2829_v34 = vrot.slane %v2369_v15, 2 }
 0x16f   : > { %v606_v0 = vsel %vm595_vm2, %v2841_v13, %v605_v1  ;;  %v1457_v26 = vshrl.u32 %v1444_v50, 16  ;;  %v1459_v56 = vshll.u32 %v1444_v50, 16  ;;  %v1464_v3 = vshll.u32 %v2373_v8, 16 }
 0x170   : > { %v626_v22 = vadd.f32 %v606_v0, %v565_v19  ;;  %v666_v51 = vsel %vm655_vm3, %v2842_v5, %v665_v28  ;;  %v627_v21 = vadd.f32 %v608_v43, %v566_v24  ;;  %v668_v48 = vsel %vm655_vm3, %v665_v28, %v2829_v34 }
 0x171   : > { %v726_v60 = vrot.slane %v703_v12, 3  ;;  %v2828_v35 = vrot.slane %v2380_v57, 3  ;;  %v1461_v19 = vrot.slane %v1459_v56, 1  ;;  %v2394_v10 = vrot.slane %v1464_v3, 1 }
 0x172   : > { %v686_v29 = vadd.f32 %v666_v51, %v626_v22  ;;  %v687_v11 = vadd.f32 %v668_v48, %v627_v21  ;;  %v763_v18 = vmul.f32 %v2031_v49, %v2098_v63  ;;  %v2843_v1 = vrot.slane %v2138_v44, 3 }
 0x173   : > { %v729_v24 = vsel %vm716_vm4, %v726_v60, %v2828_v35  ;;  %v2406_v28 = vmul.f32 %v2031_v49, %v2130_v38  ;;  %v824_v12 = vmul.f32 %v2033_v53, %v2098_v63  ;;  %v1462_v13 = vor.u32 %v1461_v19, %v1457_v26 }
 0x174   : > { %v727_v50 = vsel %vm716_vm4, %v2843_v1, %v726_v60  ;;  %v748_v43 = vadd.f32 %v729_v24, %v687_v11  ;;  %v786_v22 = vrot.slane %v763_v18, 4  ;;  %v2413_v44 = vmul.f32 %v2033_v53, %v2130_v38  ;;  %v2429_v60 = vld [vmem:[#allocation2 + $0x20] sm:$0x1f] }
 0x175   : > { %v747_v0 = vadd.f32 %v727_v50, %v686_v29  ;;  %v2826_v5 = vrot.slane %v2406_v28, 4  ;;  %v847_v51 = vrot.slane %v824_v12, 5  ;;  %v884_v56 = vmul.f32 %v2035_v54, %v2098_v63 }
 0x176   : > { %v1467_v3 = vsel %vm1455_vm8, %v1462_v13, %v2394_v10  ;;  %v2844_v21 = vrot.slane %v2157_v4, 4  ;;  %v2424_v48 = vmul.f32 %v2035_v54, %v2130_v38  ;;  %v2427_v29 = vunpack.c.h.bf16 %v2213_v16 }
 0x177   : > { %1790 = vmatprep.mubr.bf16.mxu1 %v1467_v3  ;;  %v789_v63 = vsel %vm512_vm1, %v786_v22, %v2826_v5  ;;  %v2845_v11 = vrot.slane %v2174_v2, 5  ;;  %v2823_v18 = vrot.slane %v2413_v44, 5  ;;  %v907_v50 = vrot.slane %v884_v56, 6 }
 0x178   : > { %v787_v26 = vsel %vm512_vm1, %v2844_v21, %v786_v22  ;;  %v808_v1 = vadd.f32 %v789_v63, %v748_v43  ;;  %v2819_v24 = vrot.slane %v2424_v48, 6  ;;  %v968_v16 = vmul.f32 %v2037_v55, %v2220_v20 }
 0x179   : > { %v807_v19 = vadd.f32 %v787_v26, %v747_v0  ;;  %v848_v4 = vsel %vm837_vm5, %v2845_v11, %v847_v51  ;;  %v850_v12 = vsel %vm837_vm5, %v847_v51, %v2823_v18  ;;  %v2446_v0 = vmul.f32 %v2037_v55, %v2427_v29  ;;  %v2455_v26 = vld [vmem:[#allocation2 + $0x20] sm:$0x3f] }
 0x17a   : > { %v2820_v2 = vrot.slane %v2429_v60, 4  ;;  %v869_v22 = vadd.f32 %v850_v12, %v808_v1  ;;  %v2846_v43 = vrot.slane %v2186_v6, 6  ;;  %v910_v3 = vsel %vm897_vm6, %v907_v50, %v2819_v24  ;;  %v2847_v6 = vld [vmem:[#allocation3_spill] sm:$0xff] }
 0x17b   : > { %v868_v13 = vadd.f32 %v848_v4, %v807_v19  ;;  %v988_v21 = vrot.slane %v968_v16, 7  ;;  %v2822_v63 = vrot.slane %v2446_v0, 7  ;;  %v1031_v11 = vmul.f32 %v2847_v6, %v2220_v20 }
 0x17c   : > { %v908_v56 = vsel %vm897_vm6, %v2846_v43, %v907_v50  ;;  %v2462_v19 = vsel %vm512_vm1, %v2134_v39, %v2820_v2  ;;  %v929_v4 = vadd.f32 %v910_v3, %v869_v22  ;;  %v1032_v12 = vmul.f32 %v2847_v6, %v2427_v29 }
 0x17d   : > { %v928_v51 = vadd.f32 %v908_v56, %v868_v13  ;;  %v989_v50 = vsel %vm980_vm7, %v986_v32, %v988_v21  ;;  %v2821_v16 = vunpack.c.l.bf16 %v2462_v19  ;;  %v2472_v13 = vld [vmem:[#allocation2 + $0x20] sm:$0x7f]  ;;  %v991_v43 = vsel %vm980_vm7, %v988_v21, %v2822_v63 }
 0x17e   : > { %v1061_v20 = vmul.f32 %v2027_v45, %v2427_v29  ;;  %v2825_v22 = vrot.slane %v2455_v26, 4  ;;  %v1010_v3 = vadd.f32 %v991_v43, %v929_v4  ;;  %v1127_v1 = vmul.f32 %v2021_v46, %v2427_v29 }
 0x17f   : > { %v1009_v56 = vadd.f32 %v989_v50, %v928_v51  ;;  %v2483_v32 = vmul.f32 %v2027_v45, %v2821_v16  ;;  %v1191_v24 = vmul.f32 %v2039_v30, %v2427_v29  ;;  %v2824_v4 = vrot.slane %v2472_v13, 4 }
 0x180   : > { %v1083_v21 = vrot.slane %v1061_v20, 1  ;;  %v2493_v51 = vsel %vm512_vm1, %v2134_v39, %v2825_v22  ;;  %v1041_v50 = vadd.f32 %v1032_v12, %v1010_v3  ;;  %v1149_v63 = vrot.slane %v1127_v1, 2 }
 0x181   : > { %v1040_v2 = vadd.f32 %v1031_v11, %v1009_v56  ;;  %v2827_v43 = vrot.slane %v2483_v32, 1  ;;  %v1115_v16 = vunpack.c.l.bf16 %v2493_v51  ;;  %v1213_v11 = vrot.slane %v1191_v24, 3 }
 0x182   : > { %v1084_v18 = vsel %vm595_vm2, %v1081_v52, %v1083_v21  ;;  %v2505_v56 = vsel %vm512_vm1, %v2134_v39, %v2824_v4  ;;  %v1257_v20 = vmul.f32 %v2041_v58, %v2427_v29  ;;  %v1150_v33 = vsel %vm655_vm3, %v1147_v9, %v1149_v63  ;;  %v2518_v52 = vld [vmem:[#allocation2 + $0x20] sm:$0xff] }
 0x183   : > { %v1086_v12 = vsel %vm595_vm2, %v1083_v21, %v2827_v43  ;;  %v1104_v3 = vadd.f32 %v1084_v18, %v1040_v2  ;;  %v2513_v1 = vmul.f32 %v2021_v46, %v1115_v16  ;;  %v2521_v4 = vmul.f32 %v2039_v30, %v1115_v16 }
 0x184   : > { %v1105_v24 = vadd.f32 %v1086_v12, %v1041_v50  ;;  %v2849_v22 = vrot.slane %v2283_v14, 3  ;;  %v1245_v21 = vunpack.c.l.bf16 %v2505_v56  ;;  %v1279_v43 = vrot.slane %v1257_v20, 4 }
 0x185   : > { %v1151_v18 = vrot.slane %v2513_v1, 2  ;;  %v1170_v2 = vadd.f32 %v1150_v33, %v1104_v3  ;;  %v1321_v23 = vmul.f32 %v2045_v61, %v2427_v29  ;;  %v2836_v9 = vrot.slane %v2521_v4, 3 }
 0x186   : > { %v1214_v5 = vsel %vm716_vm4, %v2849_v22, %v1213_v11  ;;  %v2532_v50 = vmul.f32 %v2041_v58, %v1245_v21  ;;  %v2535_v16 = vmul.f32 %v2045_v61, %v1245_v21  ;;  %v2850_v20 = vrot.slane %v2305_v37, 4 }
 0x187   : > { %v1152_v22 = vsel %vm655_vm3, %v1149_v63, %v1151_v18  ;;  %v1234_v12 = vadd.f32 %v1214_v5, %v1170_v2  ;;  %v1343_v33 = vrot.slane %v1321_v23, 5  ;;  %v1216_v34 = vsel %vm716_vm4, %v1213_v11, %v2836_v9 }
 0x188   : > { %v1280_v3 = vsel %vm512_vm1, %v2850_v20, %v1279_v43  ;;  %v1171_v35 = vadd.f32 %v1152_v22, %v1105_v24  ;;  %v2833_v21 = vrot.slane %v2532_v50, 4  ;;  %v2832_v36 = vrot.slane %v2535_v16, 5 }
 0x189   : > { %v1300_v14 = vadd.f32 %v1280_v3, %v1234_v12  ;;  %v1344_v5 = vsel %vm837_vm5, %v1341_v27, %v1343_v33  ;;  %v2851_v37 = vrot.slane %v2518_v52, 4  ;;  %v1387_v11 = vmul.f32 %v2047_v62, %v2427_v29 }
 0x18a   : > { %v1235_v24 = vadd.f32 %v1216_v34, %v1171_v35  ;;  %v1282_v2 = vsel %vm512_vm1, %v1279_v43, %v2833_v21  ;;  %v1346_v59 = vsel %vm837_vm5, %v1343_v33, %v2832_v36  ;;  %v1468_v12 = vshrl.u32 %v2373_v8, 16  ;;  %v2852_v35 = vld [vmem:[#allocation4_spill] sm:$0xff] }
 0x18b   : > { %v2558_v63 = vsel %vm512_vm1, %v2134_v39, %v2851_v37  ;;  %v1364_v23 = vadd.f32 %v1344_v5, %v1300_v14  ;;  %v1409_v22 = vrot.slane %v1387_v11, 6  ;;  %v2835_v20 = vunpack.c.l.bf16 %v2549_v25  ;;  %v631_v37 = vld [vmem:[#allocation2 + $0x20] sm:$0x3] }
 0x18c   : > { %v1375_v27 = vunpack.c.l.bf16 %v2558_v63  ;;  %v1301_v3 = vadd.f32 %v1282_v2, %v1235_v24  ;;  %v558_v34 = vmul.f32 %v2015_v41, %v2130_v38  ;;  %v559_v43 = vmul.f32 %v2015_v41, %v2852_v35 }
 0x18d   : > { %v2853_v33 = vrot.slane %v2332_v7, 6  ;;  %v1470_v5 = vor.u32 %v1468_v12, %v2394_v10  ;;  %v584_v8 = vmul.f32 %v2024_v47, %v2852_v35  ;;  %v2587_v11 = vmul.f32 %v2024_v47, %v2835_v20 }
 0x18e   : > { %v2572_v29 = vmul.f32 %v2047_v62, %v1375_v27  ;;  %v1365_v24 = vadd.f32 %v1346_v59, %v1301_v3  ;;  %v567_v27 = vadd.f32 %v558_v34, %v2013_v40  ;;  %v568_v7 = vadd.f32 %v559_v43, %v2013_v40 }
 0x18f   : > { %v1410_v14 = vsel %vm897_vm6, %v2853_v33, %v1409_v22  ;;  %v609_v36 = vrot.slane %v584_v8, 1  ;;  %v611_v33 = vrot.slane %v2587_v11, 1  ;;  %v632_v10 = vunpack.c.l.bf16 %v631_v37 }
 0x190   : > { %v2834_v38 = vrot.slane %v2572_v29, 6  ;;  %v1430_v2 = vadd.f32 %v1410_v14, %v1364_v23  ;;  %v644_v47 = vmul.f32 %v2017_v42, %v2852_v35  ;;  %v705_v59 = vmul.f32 %v2029_v31, %v2852_v35  ;;  %v752_v23 = vld [vmem:[#allocation2 + $0x20] sm:$0x7] }
 0x191   : > { %v2854_v34 = vrot.slane %v2362_v17, 1  ;;  %v612_v37 = vsel %vm595_vm2, %v609_v36, %v611_v33  ;;  %v2607_v14 = vmul.f32 %v2017_v42, %v632_v10  ;;  %v753_v17 = vunpack.c.l.bf16 %v752_v23 }
 0x192   : > { %v1412_v12 = vsel %vm897_vm6, %v1409_v22, %v2834_v38  ;;  %v1439_v21 = vmax.f32 %v1430_v2, 0.0  ;;  %v629_v8 = vadd.f32 %v612_v37, %v568_v7  ;;  %v669_v2 = vrot.slane %v644_v47, 2 }
 0x193   : > { %v1431_v3 = vadd.f32 %v1412_v12, %v1365_v24  ;;  %v610_v43 = vsel %vm595_vm2, %v2854_v34, %v609_v36  ;;  %v2610_v38 = vmul.f32 %v2029_v31, %v632_v10  ;;  %v671_v24 = vrot.slane %v2607_v14, 2 }
 0x194   : > { %v628_v22 = vadd.f32 %v610_v43, %v567_v27  ;;  %v730_v12 = vrot.slane %v705_v59, 3  ;;  %v2855_v34 = vrot.slane %v2369_v15, 2  ;;  %v765_v42 = vmul.f32 %v2031_v49, %v2852_v35  ;;  %v873_v59 = vld [vmem:[#allocation2 + $0x20] sm:$0xf] }
 0x195   : > { %v1440_v20 = vmax.f32 %v1431_v3, 0.0  ;;  %v732_v36 = vrot.slane %v2610_v38, 3  ;;  %v826_v27 = vmul.f32 %v2033_v53, %v2852_v35  ;;  %v672_v31 = vsel %vm655_vm3, %v669_v2, %v671_v24 }
 0x196   : > { %v670_v9 = vsel %vm655_vm3, %v2855_v34, %v669_v2  ;;  %v2856_v47 = vrot.slane %v2380_v57, 3  ;;  %v689_v23 = vadd.f32 %v672_v31, %v629_v8  ;;  %v2633_v43 = vmul.f32 %v2031_v49, %v753_v17 }
 0x197   : > { %v2621_v7 = vpack.c.bf16 %v1440_v20, %v1439_v21  ;;  %v688_v10 = vadd.f32 %v670_v9, %v628_v22  ;;  %v733_v3 = vsel %vm716_vm4, %v730_v12, %v732_v36  ;;  %v790_v21 = vrot.slane %v765_v42, 4 }
 0x198   : > { %v731_v15 = vsel %vm716_vm4, %v2856_v47, %v730_v12  ;;  %v2637_v2 = vmul.f32 %v2033_v53, %v753_v17  ;;  %v851_v9 = vrot.slane %v826_v27, 5  ;;  %v750_v57 = vadd.f32 %v733_v3, %v689_v23 }
 0x199   : > { %v1472_v20 = vshll.u32 %v2621_v7, 16  ;;  %v749_v37 = vadd.f32 %v731_v15, %v688_v10  ;;  %v2857_v22 = vrot.slane %v2406_v28, 4  ;;  %v792_v34 = vrot.slane %v2633_v43, 4 }
 0x19a   : > { %v874_v31 = vunpack.c.l.bf16 %v873_v59  ;;  %v2858_v42 = vrot.slane %v2413_v44, 5  ;;  %v853_v10 = vrot.slane %v2637_v2, 5  ;;  %v886_v28 = vmul.f32 %v2035_v54, %v2852_v35 }
 0x19b   : > { %v791_v8 = vsel %vm512_vm1, %v2857_v22, %v790_v21  ;;  %v2643_v12 = vrot.slane %v1472_v20, 1  ;;  %v793_v53 = vsel %vm512_vm1, %v790_v21, %v792_v34  ;;  %v946_v27 = vrot.slane %v873_v59, 4 }
 0x19c   : > { %v809_v49 = vadd.f32 %v791_v8, %v749_v37  ;;  %v852_v47 = vsel %vm837_vm5, %v2858_v42, %v851_v9  ;;  %v2655_v17 = vmul.f32 %v2035_v54, %v874_v31  ;;  %v810_v23 = vadd.f32 %v793_v53, %v750_v57 }
 0x19d   : > { %v1475_v15 = vsel %vm1455_vm8, %v1470_v5, %v2643_v12  ;;  %v854_v44 = vsel %vm837_vm5, %v851_v9, %v853_v10  ;;  %v911_v20 = vrot.slane %v886_v28, 6  ;;  %v947_v35 = vsel %vm512_vm1, %v2134_v39, %v946_v27 }
 0x19e   : > { %v870_v3 = vadd.f32 %v852_v47, %v809_v49  ;;  %1791 = vmatmul.mubr.bf16.vlgmr.msra.gmra.mrb[0].mxu1 %v1475_v15  ;;  %v913_v21 = vrot.slane %v2655_v17, 6  ;;  %v1021_v54 = vunpack.c.h.bf16 %v2462_v19  ;;  %v871_v37 = vadd.f32 %v854_v44, %v810_v23 }
 0x19f   : > { %v958_v59 = vunpack.c.l.bf16 %v947_v35  ;;  %v959_v22 = vunpack.c.h.bf16 %v947_v35  ;;  %v2859_v5 = vrot.slane %v2429_v60, 4  ;;  %v2860_v8 = vrot.slane %v2424_v48, 6 }
 0x1a0   : > { %v914_v31 = vsel %vm897_vm6, %v911_v20, %v913_v21  ;;  %v1063_v53 = vmul.f32 %v2027_v45, %v1021_v54  ;;  %v1116_v48 = vunpack.c.h.bf16 %v2493_v51  ;;  %v2861_v28 = vrot.slane %v2455_v26, 4 }
 0x1a1   : > { %v2668_v57 = vunpack.c.l.bf16 %v2859_v5  ;;  %v912_v9 = vsel %vm897_vm6, %v2860_v8, %v911_v20  ;;  %v931_v42 = vadd.f32 %v914_v31, %v871_v37  ;;  %v970_v39 = vmul.f32 %v2037_v55, %v958_v59 }
 0x1a2   : > { %v930_v49 = vadd.f32 %v912_v9, %v870_v3  ;;  %v2678_v47 = vmul.f32 %v2037_v55, %v959_v22  ;;  %v1117_v27 = vunpack.c.l.bf16 %v2861_v28  ;;  %v1246_v44 = vunpack.c.h.bf16 %v2505_v56 }
 0x1a3   : > { %v2683_v60 = vmul.f32 %v2027_v45, %v2668_v57  ;;  %v992_v15 = vrot.slane %v970_v39, 7  ;;  %v2862_v3 = vrot.slane %v2472_v13, 4  ;;  %v1087_v20 = vrot.slane %v1063_v53, 1 }
 0x1a4   : > { %v994_v23 = vrot.slane %v2678_v47, 7  ;;  %v1129_v37 = vmul.f32 %v2021_v46, %v1116_v48  ;;  %v2695_v45 = vmul.f32 %v2021_v46, %v1117_v27  ;;  %v2863_v51 = vrot.slane %v2446_v0, 7 }
 0x1a5   : > { %v1247_v55 = vunpack.c.l.bf16 %v2862_v3  ;;  %v1089_v35 = vrot.slane %v2683_v60, 1  ;;  %v1193_v56 = vmul.f32 %v2039_v30, %v1116_v48  ;;  %v2705_v13 = vmul.f32 %v2039_v30, %v1117_v27  ;;  %v1735_v60 = vld [vmem:[%s2805_s5] ss:$0 sm:$0xff] }
 0x1a6   : > { %v993_v26 = vsel %vm980_vm7, %v2863_v51, %v992_v15  ;;  %v995_v59 = vsel %vm980_vm7, %v992_v15, %v994_v23  ;;  %v2864_v8 = vunpack.c.l.bf16 %v2462_v19  ;;  %v1034_v9 = vmul.f32 %v2847_v6, %v1021_v54 }
 0x1a7   : > { %v1011_v22 = vadd.f32 %v993_v26, %v930_v49  ;;  %v1012_v5 = vadd.f32 %v995_v59, %v931_v42  ;;  %v1153_v0 = vrot.slane %v1129_v37, 2  ;;  %v1155_v31 = vrot.slane %v2695_v45, 2 }
 0x1a8   : > { %v1033_v46 = vmul.f32 %v2847_v6, %v2864_v8  ;;  %v1217_v39 = vrot.slane %v1193_v56, 3  ;;  %v1219_v53 = vrot.slane %v2705_v13, 3  ;;  %v1259_v48 = vmul.f32 %v2041_v58, %v1246_v44 }
 0x1a9   : > { %v1043_v15 = vadd.f32 %v1034_v9, %v1012_v5  ;;  %v1260_v30 = vmul.f32 %v2041_v58, %v1247_v55  ;;  %v2865_v49 = vrot.slane %v2483_v32, 1  ;;  %v1090_v54 = vsel %vm595_vm2, %v1087_v20, %v1089_v35 }
 0x1aa   : > { %v1042_v28 = vadd.f32 %v1033_v46, %v1011_v22  ;;  %v1154_v42 = vsel %vm655_vm3, %v1151_v18, %v1153_v0  ;;  %v1156_v27 = vsel %vm655_vm3, %v1153_v0, %v1155_v31  ;;  %v1283_v51 = vrot.slane %v1259_v48, 4 }
 0x1ab   : > { %v1088_v19 = vsel %vm595_vm2, %v2865_v49, %v1087_v20  ;;  %v1107_v37 = vadd.f32 %v1090_v54, %v1043_v15  ;;  %v1285_v58 = vrot.slane %v1260_v30, 4  ;;  %v1323_v32 = vmul.f32 %v2045_v61, %v1246_v44 }
 0x1ac   : > { %v1106_v3 = vadd.f32 %v1088_v19, %v1042_v28  ;;  %v1324_v26 = vmul.f32 %v2045_v61, %v1247_v55  ;;  %v1376_v59 = vunpack.c.h.bf16 %v2558_v63  ;;  %v2866_v20 = vrot.slane %v2518_v52, 4 }
 0x1ad   : > { %v1173_v22 = vadd.f32 %v1156_v27, %v1107_v37  ;;  %v2867_v18 = vrot.slane %v2521_v4, 3  ;;  %v1220_v8 = vsel %vm716_vm4, %v1217_v39, %v1219_v53  ;;  %v1347_v46 = vrot.slane %v1323_v32, 5 }
 0x1ae   : > { %v1377_v56 = vunpack.c.l.bf16 %v2866_v20  ;;  %v1172_v1 = vadd.f32 %v1154_v42, %v1106_v3  ;;  %v1349_v9 = vrot.slane %v1324_v26, 5  ;;  %v1389_v44 = vmul.f32 %v2047_v62, %v1376_v59 }
 0x1af   : > { %v1218_v5 = vsel %vm716_vm4, %v2867_v18, %v1217_v39  ;;  %v1237_v55 = vadd.f32 %v1220_v8, %v1173_v22  ;;  %v2868_v52 = vunpack.c.l.bf16 %v2549_v25  ;;  %v2869_v4 = vrot.slane %v2532_v50, 4 }
 0x1b0   : > { %v1390_v61 = vmul.f32 %v2047_v62, %v1377_v56  ;;  %v1236_v63 = vadd.f32 %v1218_v5, %v1172_v1  ;;  %v1286_v15 = vsel %vm512_vm1, %v1283_v51, %v1285_v58  ;;  %v1413_v48 = vrot.slane %v1389_v44, 6 }
 0x1b1   : > { %v560_v0 = vmul.f32 %v2015_v41, %v2868_v52  ;;  %v1284_v28 = vsel %vm512_vm1, %v2869_v4, %v1283_v51  ;;  %v1303_v49 = vadd.f32 %v1286_v15, %v1237_v55  ;;  %v2870_v62 = vrot.slane %v2535_v16, 5 }
 0x1b2   : > { %v1415_v39 = vrot.slane %v1390_v61, 6  ;;  %v1302_v30 = vadd.f32 %v1284_v28, %v1236_v63  ;;  %v1350_v25 = vsel %vm837_vm5, %v1347_v46, %v1349_v9  ;;  %v2871_v27 = vrot.slane %v2572_v29, 6 }
 0x1b3   : > { %v569_v19 = vadd.f32 %v560_v0, %v2013_v40  ;;  %v1348_v54 = vsel %vm837_vm5, %v2870_v62, %v1347_v46  ;;  %v1367_v41 = vadd.f32 %v1350_v25, %v1303_v49  ;;  %v1476_v29 = vshrl.u32 %v2621_v7, 16 }
 0x1b4   : > { %v1366_v42 = vadd.f32 %v1348_v54, %v1302_v30  ;;  %v1414_v3 = vsel %vm897_vm6, %v2871_v27, %v1413_v48  ;;  %v1416_v37 = vsel %vm897_vm6, %v1413_v48, %v1415_v39 }
 0x1b5   : > { %v630_v50 = vadd.f32 %v611_v33, %v569_v19  ;;  %v1433_v32 = vadd.f32 %v1416_v37, %v1367_v41  ;;  %v1478_v1 = vor.u32 %v1476_v29, %v2643_v12 }
 0x1b6   : > { %v1432_v51 = vadd.f32 %v1414_v3, %v1366_v42 }
 0x1b7   : > { %v690_v40 = vadd.f32 %v671_v24, %v630_v50  ;;  %v1442_v26 = vmax.f32 %v1433_v32, 0.0 }
 0x1b8   : > { %v1441_v16 = vmax.f32 %v1432_v51, 0.0 }
 0x1b9   : > { %v751_v59 = vadd.f32 %v732_v36, %v690_v40  ;;  %v1035_v36 = vmul.f32 %v2847_v6, %v2668_v57 }
 0x1ba   : > { %v1447_v20 = vpack.c.bf16 %v1442_v26, %v1441_v16 }
 0x1bb   : > { %v811_v11 = vadd.f32 %v792_v34, %v751_v59 }
 0x1bc   : > { %v1480_v33 = vshll.u32 %v1447_v20, 16 }
 0x1bd   : > { %v872_v56 = vadd.f32 %v853_v10, %v811_v11 }
 0x1be   : > { %v1482_v22 = vrot.slane %v1480_v33, 1 }
 0x1bf   : > { %v932_v14 = vadd.f32 %v913_v21, %v872_v56 }
 0x1c0   : > { %v1483_v24 = vsel %vm1455_vm8, %v1478_v1, %v1482_v22 }
 0x1c1   : > { %v1013_v38 = vadd.f32 %v994_v23, %v932_v14  ;;  %1794 = vmatprep.mubr.bf16.mxu1 %v1483_v24  ;;  %v1484_v23 = vshrl.u32 %v1447_v20, 16 }
 0x1c3   : > { %v1044_v7 = vadd.f32 %v1035_v36, %v1013_v38  ;;  %v1486_v18 = vor.u32 %v1484_v23, %v1482_v22 }
 0x1c5   : > { %v1108_v43 = vadd.f32 %v1089_v35, %v1044_v7 }
 0x1c7   : > { %v1174_v2 = vadd.f32 %v1155_v31, %v1108_v43 }
 0x1c9   : > { %v1238_v34 = vadd.f32 %v1219_v53, %v1174_v2 }
 0x1cb   : > { %v1304_v12 = vadd.f32 %v1285_v58, %v1238_v34 }
 0x1cd   : > { %v1368_v10 = vadd.f32 %v1349_v9, %v1304_v12 }
 0x1cf   : > { %v1434_v17 = vadd.f32 %v1415_v39, %v1368_v10 }
 0x1d1   : > { %v1443_v21 = vmax.f32 %v1434_v17, 0.0 }
 0x1d3   : > { %v1448_v47 = vpack.c.bf16 %v1443_v21, %v1443_v21 }
 0x1d5   : > { %v1488_v6 = vshll.u32 %v1448_v47, 16 }
 0x1d7   : > { %v1490_v57 = vrot.slane %v1488_v6, 1 }
 0x1d9   : > { %v1491_v5 = vsel %vm1455_vm8, %v1486_v18, %v1490_v57 }
 0x1da   : > { %1795 = vmatmul.mubr.bf16.gmra.mrb[4].mxu1 %v1491_v5 }
 0x271   : > { %v1792_v35 = vpop.f32.mrb[0].mxu1 }
 0x272   : > { %v1587_v45 = vadd.f32 %v1792_v35, %v1735_v60  ;;  %v1578_v13 = vpop.f32.mrb[1].mxu1 }
 0x273   : > { %v1579_v31 = vadd.f32 %v1735_v60, %v1578_v13  ;;  %v1793_v53 = vpop.f32.mrb[2].mxu1 }
 0x274   : > { %v1756_v58 = vpack.c.bf16 %v1587_v45, %v1587_v45  ;;  %v1590_v8 = vadd.f32 %v1793_v53, %v1735_v60  ;;  %v1581_v46 = vpop.f32.mrb[3].mxu1 }
 0x275   : > { %v1754_v9 = vpack.c.bf16 %v1579_v31, %v1579_v31  ;;  %v1582_v44 = vadd.f32 %v1735_v60, %v1581_v46 }
 0x276   : > { %1644 = vst.msk [vmem:[%s253_s27 + $0x8] sm:$0xf] %vm1641_vm9, %v1756_v58  ;;  %v1757_v61 = vpack.c.bf16 %v1590_v8, %v1590_v8 }
 0x277   : > { %1642 = vst.msk [vmem:[%s253_s27] sm:$0xf] %vm1641_vm9, %v1754_v9  ;;  %v1755_v63 = vpack.c.bf16 %v1582_v44, %v1582_v44 }
 0x278   : > { %1645 = vst.msk [vmem:[%s253_s27 + $0xc] sm:$0xf] %vm1641_vm9, %v1757_v61 }
 0x279   : > { %1643 = vst.msk [vmem:[%s253_s27 + $0x4] sm:$0xf] %vm1641_vm9, %v1755_v63 }
 0x2ad   : > { %v1796_v55 = vpop.f32.mrb[4].mxu1 }
 0x2ae   : > { %v1603_v52 = vadd.f32 %v1796_v55, %v1735_v60  ;;  %v1594_v0 = vpop.f32.mrb[5].mxu1 }
 0x2af   : > { %v1595_v4 = vadd.f32 %v1735_v60, %v1594_v0  ;;  %v1797_v28 = vpop.f32.mrb[6].mxu1 }
 0x2b0   : > { %v1760_v15 = vpack.c.bf16 %v1603_v52, %v1603_v52  ;;  %v1606_v48 = vadd.f32 %v1797_v28, %v1735_v60  ;;  %v1597_v39 = vpop.f32.mrb[7].mxu1 }
 0x2b1   : > { %v1758_v30 = vpack.c.bf16 %v1595_v4, %v1595_v4  ;;  %v1598_v49 = vadd.f32 %v1735_v60, %v1597_v39 }
 0x2b2   : > { %1648 = vst.msk [vmem:[%s253_s27 + $0x18] sm:$0xf] %vm1641_vm9, %v1760_v15  ;;  %v1761_v19 = vpack.c.bf16 %v1606_v48, %v1606_v48 }
 0x2b3   : > { %1646 = vst.msk [vmem:[%s253_s27 + $0x10] sm:$0xf] %vm1641_vm9, %v1758_v30  ;;  %v1759_v62 = vpack.c.bf16 %v1598_v49, %v1598_v49 }
 0x2b4   : > { %1649 = vst.msk [vmem:[%s253_s27 + $0x1c] sm:$0xf] %vm1641_vm9, %v1761_v19 }
 0x2b5   : > { %1647 = vst.msk [vmem:[%s253_s27 + $0x14] sm:$0xf] %vm1641_vm9, %v1759_v62 }
 0x2b6 PF: > { %s16_s21 = sadd.s32 1, %s1865_s21  }
 0x2b7   : > { %p13_p4 = scmp.ge.s32.totalorder %s16_s21, 6  }
 0x2b9   :  { %15 = sbr.rel (!%p13_p4) target bundleno = 1 (0x1), region = 74 }

</bundles_post_ra>
